<compile_context>
chip_gen: v6e
topology: v6e:2x2x1
jax: 0.10.0
libtpu: 0.0.40
codegen_flags: <defaults>
</compile_context>

<pallas_src>
import math
import functools

import jax
import jax.numpy as jnp
from jax.experimental import pallas as pl
from jax.experimental.pallas import tpu as pltpu


# -----------------------------------------------------------------------------
# Parameter packing (done ONCE, outside the forward call).
# -----------------------------------------------------------------------------
def pack_mhsa_params(wq, wk, wv, wo, bo, num_heads, *, compute_dtype=jnp.bfloat16):
    """Weights are (in_features, out_features) = torch nn.Linear weight transposed.

    Returns:
      wqkv:     (Din, 3E)   fused [Wq | Wk | Wv] in compute_dtype (one weight DMA).
      wo_heads: (H, d_k, E) output projection split by head along its input rows,
                            so the kernel accumulates per-head partial products on
                            the MXU without relayouting the attention output.
      bo:       (1, E)      output bias, kept f32 (added after f32 accumulation).
    """
    E = wq.shape[1]
    assert E % num_heads == 0
    d_k = E // num_heads
    wqkv = jnp.concatenate([wq, wk, wv], axis=1).astype(compute_dtype)
    wo_heads = jnp.asarray(wo, compute_dtype).reshape(num_heads, d_k, E)
    bo2 = jnp.asarray(bo, jnp.float32).reshape(1, E)
    return wqkv, wo_heads, bo2


# -----------------------------------------------------------------------------
# Kernel bodies.
# -----------------------------------------------------------------------------
def _write_heads(scr_ref, proj_f32, col0, d_k, compute_dtype, scale=None):
    """Scatter an (S, E)-laid-out projection into head-major scratch (H, S, d_k).

    Static lane slices + per-head full stores; runs only at qi == 0, i.e. off the
    per-tile hot path.
    """
    num_heads = scr_ref.shape[0]
    for h in range(num_heads):
        lo = col0 + h * d_k
        blk = proj_f32[:, lo:lo + d_k]
        if scale is not None:
            blk = blk * scale
        scr_ref[h] = blk.astype(compute_dtype)


def _project_self(x_ref, wqkv_ref, q_scr, k_scr, v_scr, *, d_k, scale, compute_dtype):
    E = q_scr.shape[0] * d_k
    x = x_ref[0].astype(compute_dtype)                                    # (S, Din)
    # One fused (S, Din) x (Din, 3E) MXU matmul for Q|K|V.
    proj = jnp.dot(x, wqkv_ref[...], preferred_element_type=jnp.float32)  # (S, 3E)
    _write_heads(q_scr, proj, 0, d_k, compute_dtype, scale)
    _write_heads(k_scr, proj, E, d_k, compute_dtype)
    _write_heads(v_scr, proj, 2 * E, d_k, compute_dtype)


def _project_cross(q_ref, k_ref, v_ref, wqkv_ref, q_scr, k_scr, v_scr,
                   *, d_k, scale, compute_dtype):
    E = q_scr.shape[0] * d_k
    pq = jnp.dot(q_ref[0].astype(compute_dtype), wqkv_ref[:, :E],
                 preferred_element_type=jnp.float32)
    pk = jnp.dot(k_ref[0].astype(compute_dtype), wqkv_ref[:, E:2 * E],
                 preferred_element_type=jnp.float32)
    pv = jnp.dot(v_ref[0].astype(compute_dtype), wqkv_ref[:, 2 * E:],
                 preferred_element_type=jnp.float32)
    _write_heads(q_scr, pq, 0, d_k, compute_dtype, scale)
    _write_heads(k_scr, pk, 0, d_k, compute_dtype)
    _write_heads(v_scr, pv, 0, d_k, compute_dtype)


def _attention_tile(wo_ref, bo_ref, o_ref, q_scr, k_scr, v_scr,
                    *, q_tile, compute_dtype, approx):
    num_heads, S, d_k = k_scr.shape
    E = num_heads * d_k

    if q_tile == S:
        q_h = q_scr[...]                                                  # (H, tq, d_k)
    else:
        qi = pl.program_id(1)
        start = pl.multiple_of(qi * q_tile, q_tile)
        q_h = q_scr[:, pl.ds(start, q_tile), :]                           # (H, tq, d_k)
    k_h = k_scr[...]                                                      # (H, S, d_k)
    v_h = v_scr[...]                                                      # (H, S, d_k)

    # Scores batched over heads; contracts d_k of both operands (no K transpose).
    energy = jnp.einsum("hqd,hkd->hqk", q_h, k_h,
                        preferred_element_type=jnp.float32)               # (H, tq, S)
    # TODO(synk): mask is None in the reproduced configuration; masked_fill_ not emitted.
    m = jnp.max(energy, axis=-1, keepdims=True)
    p = jnp.exp(energy - m)                                               # f32 (EUP)
    denom = jnp.sum(p, axis=-1, keepdims=True)

    pv = jnp.einsum("hqk,hkd->hqd", p.astype(compute_dtype), v_h,
                    preferred_element_type=jnp.float32)                   # (H, tq, d_k)
    # Normalize after PV: (tq, d_k) multiplies per head instead of (tq, S).
    attn = (pv * pl.reciprocal(denom, approx=approx)).astype(compute_dtype)

    # Output projection accumulated per head on the MXU:
    #   out = sum_h attn[h] @ Wo[h*d_k:(h+1)*d_k, :]
    # Mathematically identical to the (tq, E) @ (E, E) projection, but avoids
    # both the (H, tq, d_k) -> (tq, E) relayout and per-head masked lane stores.
    acc = jnp.zeros((q_tile, E), jnp.float32)
    for h in range(num_heads):
        acc = acc + jnp.dot(attn[h], wo_ref[h], preferred_element_type=jnp.float32)

    o_ref[0] = (acc + bo_ref[...]).astype(o_ref.dtype)
    # TODO(synk): attention_dropout / projection_dropout are Identity (p=0.0) and
    # re_attention=False in the reproduced configuration, so those branches are
    # intentionally not emitted.


def _mhsa_self_kernel(x_ref, wqkv_ref, wo_ref, bo_ref, o_ref, q_scr, k_scr, v_scr,
                      *, d_k, q_tile, scale, compute_dtype, approx):
    @pl.when(pl.program_id(1) == 0)
    def _():
        _project_self(x_ref, wqkv_ref, q_scr, k_scr, v_scr,
                      d_k=d_k, scale=scale, compute_dtype=compute_dtype)

    _attention_tile(wo_ref, bo_ref, o_ref, q_scr, k_scr, v_scr,
                    q_tile=q_tile, compute_dtype=compute_dtype, approx=approx)


def _mhsa_cross_kernel(q_ref, k_ref, v_ref, wqkv_ref, wo_ref, bo_ref, o_ref,
                       q_scr, k_scr, v_scr, *, d_k, q_tile, scale, compute_dtype, approx):
    @pl.when(pl.program_id(1) == 0)
    def _():
        _project_cross(q_ref, k_ref, v_ref, wqkv_ref, q_scr, k_scr, v_scr,
                       d_k=d_k, scale=scale, compute_dtype=compute_dtype)

    _attention_tile(wo_ref, bo_ref, o_ref, q_scr, k_scr, v_scr,
                    q_tile=q_tile, compute_dtype=compute_dtype, approx=approx)


# -----------------------------------------------------------------------------
# Wrapper.
# -----------------------------------------------------------------------------
def _round_up(x, m):
    return (x + m - 1) // m * m


def _padded_bytes(shape, dtype, nbuf=1):
    s = [int(d) for d in shape]
    if len(s) >= 1:
        s[-1] = _round_up(s[-1], 128)
    if len(s) >= 2:
        s[-2] = _round_up(s[-2], 8)
    n = 1
    for d in s:
        n *= d
    return n * jnp.dtype(dtype).itemsize * nbuf


def multi_head_self_attention(q, k, v, params, *, num_heads, q_tile=None,
                              self_attention=None, approx_reciprocal=None):
    """Fused MHSA forward (QKV projections + attention + output projection).

    params: output of pack_mhsa_params (pack once, reuse every call).
    self_attention: force the single-input fast path (q, k, v must be the same
      tensor). If None it is inferred via object identity, which is fragile
      under jit — pass it explicitly when possible.
    approx_reciprocal: use the EUP approximate reciprocal for the softmax
      normalization; defaults to True iff the packed compute dtype is not f32.
    """
    wqkv, wo_heads, bo2 = params
    B, S, Din = q.shape
    assert k.shape == (B, S, Din) and v.shape == (B, S, Din)
    H, d_k, E = wo_heads.shape
    assert H == num_heads and E == num_heads * d_k
    assert wqkv.shape == (Din, 3 * E)
    compute_dtype = wqkv.dtype
    if approx_reciprocal is None:
        approx_reciprocal = compute_dtype != jnp.float32
    if self_attention is None:
        self_attention = (q is k) and (k is v)

    # Query-row tile: biggest that keeps per-step overhead amortized; 256 for
    # long sequences (better MXU fill on v5e/v6e), else 128, else whole S.
    if q_tile is None:
        if S % 256 == 0 and S >= 1024:
            q_tile = 256
        elif S % 128 == 0:
            q_tile = 128
        else:
            q_tile = S
    assert S % q_tile == 0, "q_tile must divide the sequence length"
    if q_tile != S:
        assert q_tile % 8 == 0, "q_tile must be a multiple of 8 (sublane) when tiling"
    num_q_tiles = S // q_tile

    scale = 1.0 / math.sqrt(d_k)
    n_seq_streams = 1 if self_attention else 3

    # Explicit VMEM budget: v7x has 64 MiB physical / 32 MiB scoped default, so
    # do not rely on limits that are comfortable on v5e/v6e's 128 MiB.
    est = (n_seq_streams * _padded_bytes((S, Din), q.dtype, 2)        # input blocks (dbl buf)
           + _padded_bytes((Din, 3 * E), compute_dtype, 2)            # fused qkv weight
           + _padded_bytes((d_k, E), compute_dtype, 2 * num_heads)    # wo_heads
           + _padded_bytes((1, E), jnp.float32, 2)                    # bias
           + 3 * _padded_bytes((S, d_k), compute_dtype, num_heads)    # head-major scratch
           + _padded_bytes((q_tile, E), q.dtype, 2))                  # output block (dbl buf)
    vmem_limit_bytes = int(min(max(int(est * 1.25) + (4 << 20), 32 << 20), 60 << 20))

    compiler_params = pltpu.CompilerParams(
        # Batch axis across cores (megacore / 2nd TC on v7x); the q-tile axis
        # must stay "arbitrary": the head-major QKV scratch is filled at qi == 0
        # and reused by the remaining q tiles of the same batch element.
        # TODO(synk): for B == 1 on v7x, hoist the projection into its own call
        # so the q-tile axis can be marked "parallel" across the two TensorCores.
        dimension_semantics=("parallel", "arbitrary"),
        vmem_limit_bytes=vmem_limit_bytes)

    out_shape = jax.ShapeDtypeStruct((B, S, E), q.dtype)

    def _build_and_run(single_buffer_weights):
        def const_spec(shape):
            zeros = (0,) * len(shape)
            if single_buffer_weights:
                # Weights/bias never change across the grid: single-buffer them
                # to reclaim VMEM (pure capacity win, no throughput cost).
                return pl.BlockSpec(shape, lambda b, t, _z=zeros: _z,
                                    pipeline_mode=pl.Buffered(1))
            return pl.BlockSpec(shape, lambda b, t, _z=zeros: _z)

        seq_spec = pl.BlockSpec((1, S, Din), lambda b, t: (b, 0, 0))
        wqkv_spec = const_spec((Din, 3 * E))
        wo_spec = const_spec((num_heads, d_k, E))
        bo_spec = const_spec((1, E))
        out_spec = pl.BlockSpec((1, q_tile, E), lambda b, t: (b, t, 0))

        scratch = [pltpu.VMEM((num_heads, S, d_k), compute_dtype),    # Q (pre-scaled)
                   pltpu.VMEM((num_heads, S, d_k), compute_dtype),    # K
                   pltpu.VMEM((num_heads, S, d_k), compute_dtype)]    # V

        if self_attention:
            kernel = functools.partial(
                _mhsa_self_kernel, d_k=d_k, q_tile=q_tile, scale=scale,
                compute_dtype=compute_dtype, approx=approx_reciprocal)
            in_specs = [seq_spec, wqkv_spec, wo_spec, bo_spec]
            args = (q, wqkv, wo_heads, bo2)
        else:
            kernel = functools.partial(
                _mhsa_cross_kernel, d_k=d_k, q_tile=q_tile, scale=scale,
                compute_dtype=compute_dtype, approx=approx_reciprocal)
            in_specs = [seq_spec, seq_spec, seq_spec, wqkv_spec, wo_spec, bo_spec]
            args = (q, k, v, wqkv, wo_heads, bo2)

        return pl.pallas_call(
            kernel,
            out_shape=out_shape,
            grid=(B, num_q_tiles),
            in_specs=in_specs,
            out_specs=out_spec,
            scratch_shapes=scratch,
            compiler_params=compiler_params,
        )(*args)

    try:
        return _build_and_run(True)
    except Exception:  # pragma: no cover
        # pl.Buffered(1) on the constant weight specs is a VMEM-only
        # optimization; fall back to default double buffering if the installed
        # jax does not accept pipeline_mode on pallas_call block specs.
        return _build_and_run(False)


# -----------------------------------------------------------------------------
# Pure-JAX reference (matches the torch module's math).
# -----------------------------------------------------------------------------
def _reference(q, k, v, wq, wk, wv, wo, bo, *, num_heads):
    B, S, _ = q.shape
    E = wq.shape[1]
    d_k = E // num_heads

    def split(x):
        return x.reshape(B, S, num_heads, d_k).transpose(0, 2, 1, 3)   # (B,H,S,d_k)

    with jax.default_matmul_precision("float32"):
        Q = split(q @ wq)
        K = split(k @ wk)
        V = split(v @ wv)
        energy = jnp.einsum("bhqd,bhkd->bhqk", Q, K) / math.sqrt(d_k)
        attn = jax.nn.softmax(energy, axis=-1)
        out = jnp.einsum("bhqk,bhkd->bhqd", attn, V)
        out = out.transpose(0, 2, 1, 3).reshape(B, S, E)
        return out @ wo + bo


if __name__ == "__main__":
    embed_dim, num_heads = 32, 4
    in_dims = embed_dim  # in_dims=None -> in_dims=embed_dim in the torch module

    key = jax.random.PRNGKey(0)
    keys = jax.random.split(key, 8)

    def trunc02(k_, shape):  # trunc_normal_(std=0.02) analogue
        return (0.02 * jax.random.truncated_normal(k_, -2.0, 2.0, shape)).astype(jnp.float32)

    # Stored as (in_features, out_features) = torch weight transposed.
    wq = trunc02(keys[0], (in_dims, embed_dim))
    wk = trunc02(keys[1], (in_dims, embed_dim))
    wv = trunc02(keys[2], (in_dims, embed_dim))
    wo = trunc02(keys[3], (embed_dim, embed_dim))
    bo = jnp.zeros((embed_dim,), dtype=jnp.float32)  # nn.init.zeros_(w_o.bias)

    params_f32 = pack_mhsa_params(wq, wk, wv, wo, bo, num_heads, compute_dtype=jnp.float32)
    params_bf16 = pack_mhsa_params(wq, wk, wv, wo, bo, num_heads, compute_dtype=jnp.bfloat16)

    # --- Test 1: self-attention, single q tile, f32 operands ---
    B, S = 2, 8
    x = jax.random.normal(keys[4], (B, S, in_dims), dtype=jnp.float32)
    out = multi_head_self_attention(x, x, x, params_f32, num_heads=num_heads,
                                    self_attention=True)
    out = jax.block_until_ready(out)
    ref = _reference(x, x, x, wq, wk, wv, wo, bo, num_heads=num_heads)
    assert out.shape == (B, S, embed_dim)
    assert jnp.allclose(out, ref, atol=2e-3, rtol=1e-2), "self-attn f32 mismatch"

    # --- Test 2: self-attention with multiple q tiles (scratch reuse path), f32 ---
    S2 = 16
    x2 = jax.random.normal(keys[5], (B, S2, in_dims), dtype=jnp.float32)
    out2 = multi_head_self_attention(x2, x2, x2, params_f32, num_heads=num_heads,
                                     q_tile=8, self_attention=True)
    out2 = jax.block_until_ready(out2)
    ref2 = _reference(x2, x2, x2, wq, wk, wv, wo, bo, num_heads=num_heads)
    assert jnp.allclose(out2, ref2, atol=2e-3, rtol=1e-2), "self-attn multi-tile mismatch"

    # --- Test 3: distinct q/k/v (general cross path), two q tiles, f32 ---
    q3 = jax.random.normal(keys[5], (B, S2, in_dims), dtype=jnp.float32)
    k3 = jax.random.normal(keys[6], (B, S2, in_dims), dtype=jnp.float32)
    v3 = jax.random.normal(keys[7], (B, S2, in_dims), dtype=jnp.float32)
    out3 = multi_head_self_attention(q3, k3, v3, params_f32, num_heads=num_heads, q_tile=8)
    out3 = jax.block_until_ready(out3)
    ref3 = _reference(q3, k3, v3, wq, wk, wv, wo, bo, num_heads=num_heads)
    assert jnp.allclose(out3, ref3, atol=2e-3, rtol=1e-2), "cross-attn f32 mismatch"

    # --- Test 4: bf16 MXU operands (f32 accumulation / softmax), loose check ---
    out4 = multi_head_self_attention(x, x, x, params_bf16, num_heads=num_heads,
                                     self_attention=True)
    out4 = jax.block_until_ready(out4)
    assert jnp.allclose(out4, ref, atol=2e-2, rtol=1e-1), "self-attn bf16 mismatch"

    print("KERNEL_OK")
</pallas_src>

<mosaic_0001>
module attributes {stable_mosaic.version = 11 : i64} {
  func.func @_mhsa_self_kernel(%arg0: i32, %arg1: i32, %arg2: memref<1x8x32xf32, #tpu.memory_space<vmem>>, %arg3: memref<32x96xf32, #tpu.memory_space<vmem>>, %arg4: memref<4x8x32xf32, #tpu.memory_space<vmem>>, %arg5: memref<1x32xf32, #tpu.memory_space<vmem>>, %arg6: memref<1x8x32xf32, #tpu.memory_space<vmem>>, %arg7: memref<4x8x8xf32, #tpu.memory_space<vmem>>, %arg8: memref<4x8x8xf32, #tpu.memory_space<vmem>>, %arg9: memref<4x8x8xf32, #tpu.memory_space<vmem>>) attributes {dimension_semantics = [#tpu.dimension_semantics<parallel>, #tpu.dimension_semantics<arbitrary>], iteration_bounds = array<i64: 2, 1>, scalar_prefetch = 0 : i64, scratch_operands = 3 : i64, tpu.core_type = #tpu.core_type<tc>, window_params = [{transform_indices = @transform_0, window_bounds = array<i64: 1, 8, 32>}, {pipeline_mode = #tpu.pipeline_mode<synchronous>, transform_indices = @transform_1, window_bounds = array<i64: 32, 96>}, {pipeline_mode = #tpu.pipeline_mode<synchronous>, transform_indices = @transform_2, window_bounds = array<i64: 4, 8, 32>}, {pipeline_mode = #tpu.pipeline_mode<synchronous>, transform_indices = @transform_3, window_bounds = array<i64: 1, 32>}, {transform_indices = @transform_4, window_bounds = array<i64: 1, 8, 32>}]} {
    %c0_i32 = arith.constant 0 : i32
    %0 = arith.cmpi eq, %arg1, %c0_i32 : i32
    %1 = arith.extui %0 : i1 to i32
    %c0_i32_0 = arith.constant 0 : i32
    %2 = arith.cmpi ne, %1, %c0_i32_0 : i32
    scf.if %2 {
      %c0_31 = arith.constant 0 : index
      %c0_32 = arith.constant 0 : index
      %c0_33 = arith.constant 0 : index
      %49 = vector.load %arg2[%c0_31, %c0_32, %c0_33] : memref<1x8x32xf32, #tpu.memory_space<vmem>>, vector<1x8x32xf32>
      %50 = vector.shape_cast %49 : vector<1x8x32xf32> to vector<8x32xf32>
      %c0_34 = arith.constant 0 : index
      %c0_35 = arith.constant 0 : index
      %51 = vector.load %arg3[%c0_34, %c0_35] : memref<32x96xf32, #tpu.memory_space<vmem>>, vector<32x96xf32>
      %cst_36 = arith.constant dense<0.000000e+00> : vector<8x96xf32>
      %52 = tpu.matmul %50, %51, %cst_36 {dimension_numbers = #tpu.dot_dimension_numbers<[1], [0], [0], [1], [0, 0, 1, 1], [], []>} : vector<8x32xf32>, vector<32x96xf32>, vector<8x96xf32> -> vector<8x96xf32>
      %53 = vector.extract_strided_slice %52 {offsets = [0, 0], sizes = [8, 8], strides = [1, 1]} : vector<8x96xf32> to vector<8x8xf32>
      %cst_37 = arith.constant 0.353553385 : f32
      %54 = vector.broadcast %cst_37 : f32 to vector<8x8xf32>
      %55 = arith.mulf %53, %54 : vector<8x8xf32>
      %c0_38 = arith.constant 0 : index
      %c0_39 = arith.constant 0 : index
      %c0_40 = arith.constant 0 : index
      %56 = vector.load %arg7[%c0_38, %c0_39, %c0_40] : memref<4x8x8xf32, #tpu.memory_space<vmem>>, vector<1x8x8xf32>
      %57 = vector.shape_cast %56 : vector<1x8x8xf32> to vector<8x8xf32>
      %58 = vector.shape_cast %55 : vector<8x8xf32> to vector<1x8x8xf32>
      tpu.vector_store %arg7[%c0_38, %c0_39, %c0_40], %58 {strides = array<i32>} : memref<4x8x8xf32, #tpu.memory_space<vmem>>, vector<1x8x8xf32>,
      %59 = vector.extract_strided_slice %52 {offsets = [0, 8], sizes = [8, 8], strides = [1, 1]} : vector<8x96xf32> to vector<8x8xf32>
      %cst_41 = arith.constant 0.353553385 : f32
      %60 = vector.broadcast %cst_41 : f32 to vector<8x8xf32>
      %61 = arith.mulf %59, %60 : vector<8x8xf32>
      %c1_42 = arith.constant 1 : index
      %c0_43 = arith.constant 0 : index
      %c0_44 = arith.constant 0 : index
      %62 = vector.load %arg7[%c1_42, %c0_43, %c0_44] : memref<4x8x8xf32, #tpu.memory_space<vmem>>, vector<1x8x8xf32>
      %63 = vector.shape_cast %62 : vector<1x8x8xf32> to vector<8x8xf32>
      %64 = vector.shape_cast %61 : vector<8x8xf32> to vector<1x8x8xf32>
      tpu.vector_store %arg7[%c1_42, %c0_43, %c0_44], %64 {strides = array<i32>} : memref<4x8x8xf32, #tpu.memory_space<vmem>>, vector<1x8x8xf32>,
      %65 = vector.extract_strided_slice %52 {offsets = [0, 16], sizes = [8, 8], strides = [1, 1]} : vector<8x96xf32> to vector<8x8xf32>
      %cst_45 = arith.constant 0.353553385 : f32
      %66 = vector.broadcast %cst_45 : f32 to vector<8x8xf32>
      %67 = arith.mulf %65, %66 : vector<8x8xf32>
      %c2_46 = arith.constant 2 : index
      %c0_47 = arith.constant 0 : index
      %c0_48 = arith.constant 0 : index
      %68 = vector.load %arg7[%c2_46, %c0_47, %c0_48] : memref<4x8x8xf32, #tpu.memory_space<vmem>>, vector<1x8x8xf32>
      %69 = vector.shape_cast %68 : vector<1x8x8xf32> to vector<8x8xf32>
      %70 = vector.shape_cast %67 : vector<8x8xf32> to vector<1x8x8xf32>
      tpu.vector_store %arg7[%c2_46, %c0_47, %c0_48], %70 {strides = array<i32>} : memref<4x8x8xf32, #tpu.memory_space<vmem>>, vector<1x8x8xf32>,
      %71 = vector.extract_strided_slice %52 {offsets = [0, 24], sizes = [8, 8], strides = [1, 1]} : vector<8x96xf32> to vector<8x8xf32>
      %cst_49 = arith.constant 0.353553385 : f32
      %72 = vector.broadcast %cst_49 : f32 to vector<8x8xf32>
      %73 = arith.mulf %71, %72 : vector<8x8xf32>
      %c3_50 = arith.constant 3 : index
      %c0_51 = arith.constant 0 : index
      %c0_52 = arith.constant 0 : index
      %74 = vector.load %arg7[%c3_50, %c0_51, %c0_52] : memref<4x8x8xf32, #tpu.memory_space<vmem>>, vector<1x8x8xf32>
      %75 = vector.shape_cast %74 : vector<1x8x8xf32> to vector<8x8xf32>
      %76 = vector.shape_cast %73 : vector<8x8xf32> to vector<1x8x8xf32>
      tpu.vector_store %arg7[%c3_50, %c0_51, %c0_52], %76 {strides = array<i32>} : memref<4x8x8xf32, #tpu.memory_space<vmem>>, vector<1x8x8xf32>,
      %77 = vector.extract_strided_slice %52 {offsets = [0, 32], sizes = [8, 8], strides = [1, 1]} : vector<8x96xf32> to vector<8x8xf32>
      %c0_53 = arith.constant 0 : index
      %c0_54 = arith.constant 0 : index
      %c0_55 = arith.constant 0 : index
      %78 = vector.load %arg8[%c0_53, %c0_54, %c0_55] : memref<4x8x8xf32, #tpu.memory_space<vmem>>, vector<1x8x8xf32>
      %79 = vector.shape_cast %78 : vector<1x8x8xf32> to vector<8x8xf32>
      %80 = vector.shape_cast %77 : vector<8x8xf32> to vector<1x8x8xf32>
      tpu.vector_store %arg8[%c0_53, %c0_54, %c0_55], %80 {strides = array<i32>} : memref<4x8x8xf32, #tpu.memory_space<vmem>>, vector<1x8x8xf32>,
      %81 = vector.extract_strided_slice %52 {offsets = [0, 40], sizes = [8, 8], strides = [1, 1]} : vector<8x96xf32> to vector<8x8xf32>
      %c1_56 = arith.constant 1 : index
      %c0_57 = arith.constant 0 : index
      %c0_58 = arith.constant 0 : index
      %82 = vector.load %arg8[%c1_56, %c0_57, %c0_58] : memref<4x8x8xf32, #tpu.memory_space<vmem>>, vector<1x8x8xf32>
      %83 = vector.shape_cast %82 : vector<1x8x8xf32> to vector<8x8xf32>
      %84 = vector.shape_cast %81 : vector<8x8xf32> to vector<1x8x8xf32>
      tpu.vector_store %arg8[%c1_56, %c0_57, %c0_58], %84 {strides = array<i32>} : memref<4x8x8xf32, #tpu.memory_space<vmem>>, vector<1x8x8xf32>,
      %85 = vector.extract_strided_slice %52 {offsets = [0, 48], sizes = [8, 8], strides = [1, 1]} : vector<8x96xf32> to vector<8x8xf32>
      %c2_59 = arith.constant 2 : index
      %c0_60 = arith.constant 0 : index
      %c0_61 = arith.constant 0 : index
      %86 = vector.load %arg8[%c2_59, %c0_60, %c0_61] : memref<4x8x8xf32, #tpu.memory_space<vmem>>, vector<1x8x8xf32>
      %87 = vector.shape_cast %86 : vector<1x8x8xf32> to vector<8x8xf32>
      %88 = vector.shape_cast %85 : vector<8x8xf32> to vector<1x8x8xf32>
      tpu.vector_store %arg8[%c2_59, %c0_60, %c0_61], %88 {strides = array<i32>} : memref<4x8x8xf32, #tpu.memory_space<vmem>>, vector<1x8x8xf32>,
      %89 = vector.extract_strided_slice %52 {offsets = [0, 56], sizes = [8, 8], strides = [1, 1]} : vector<8x96xf32> to vector<8x8xf32>
      %c3_62 = arith.constant 3 : index
      %c0_63 = arith.constant 0 : index
      %c0_64 = arith.constant 0 : index
      %90 = vector.load %arg8[%c3_62, %c0_63, %c0_64] : memref<4x8x8xf32, #tpu.memory_space<vmem>>, vector<1x8x8xf32>
      %91 = vector.shape_cast %90 : vector<1x8x8xf32> to vector<8x8xf32>
      %92 = vector.shape_cast %89 : vector<8x8xf32> to vector<1x8x8xf32>
      tpu.vector_store %arg8[%c3_62, %c0_63, %c0_64], %92 {strides = array<i32>} : memref<4x8x8xf32, #tpu.memory_space<vmem>>, vector<1x8x8xf32>,
      %93 = vector.extract_strided_slice %52 {offsets = [0, 64], sizes = [8, 8], strides = [1, 1]} : vector<8x96xf32> to vector<8x8xf32>
      %c0_65 = arith.constant 0 : index
      %c0_66 = arith.constant 0 : index
      %c0_67 = arith.constant 0 : index
      %94 = vector.load %arg9[%c0_65, %c0_66, %c0_67] : memref<4x8x8xf32, #tpu.memory_space<vmem>>, vector<1x8x8xf32>
      %95 = vector.shape_cast %94 : vector<1x8x8xf32> to vector<8x8xf32>
      %96 = vector.shape_cast %93 : vector<8x8xf32> to vector<1x8x8xf32>
      tpu.vector_store %arg9[%c0_65, %c0_66, %c0_67], %96 {strides = array<i32>} : memref<4x8x8xf32, #tpu.memory_space<vmem>>, vector<1x8x8xf32>,
      %97 = vector.extract_strided_slice %52 {offsets = [0, 72], sizes = [8, 8], strides = [1, 1]} : vector<8x96xf32> to vector<8x8xf32>
      %c1_68 = arith.constant 1 : index
      %c0_69 = arith.constant 0 : index
      %c0_70 = arith.constant 0 : index
      %98 = vector.load %arg9[%c1_68, %c0_69, %c0_70] : memref<4x8x8xf32, #tpu.memory_space<vmem>>, vector<1x8x8xf32>
      %99 = vector.shape_cast %98 : vector<1x8x8xf32> to vector<8x8xf32>
      %100 = vector.shape_cast %97 : vector<8x8xf32> to vector<1x8x8xf32>
      tpu.vector_store %arg9[%c1_68, %c0_69, %c0_70], %100 {strides = array<i32>} : memref<4x8x8xf32, #tpu.memory_space<vmem>>, vector<1x8x8xf32>,
      %101 = vector.extract_strided_slice %52 {offsets = [0, 80], sizes = [8, 8], strides = [1, 1]} : vector<8x96xf32> to vector<8x8xf32>
      %c2_71 = arith.constant 2 : index
      %c0_72 = arith.constant 0 : index
      %c0_73 = arith.constant 0 : index
      %102 = vector.load %arg9[%c2_71, %c0_72, %c0_73] : memref<4x8x8xf32, #tpu.memory_space<vmem>>, vector<1x8x8xf32>
      %103 = vector.shape_cast %102 : vector<1x8x8xf32> to vector<8x8xf32>
      %104 = vector.shape_cast %101 : vector<8x8xf32> to vector<1x8x8xf32>
      tpu.vector_store %arg9[%c2_71, %c0_72, %c0_73], %104 {strides = array<i32>} : memref<4x8x8xf32, #tpu.memory_space<vmem>>, vector<1x8x8xf32>,
      %105 = vector.extract_strided_slice %52 {offsets = [0, 88], sizes = [8, 8], strides = [1, 1]} : vector<8x96xf32> to vector<8x8xf32>
      %c3_74 = arith.constant 3 : index
      %c0_75 = arith.constant 0 : index
      %c0_76 = arith.constant 0 : index
      %106 = vector.load %arg9[%c3_74, %c0_75, %c0_76] : memref<4x8x8xf32, #tpu.memory_space<vmem>>, vector<1x8x8xf32>
      %107 = vector.shape_cast %106 : vector<1x8x8xf32> to vector<8x8xf32>
      %108 = vector.shape_cast %105 : vector<8x8xf32> to vector<1x8x8xf32>
      tpu.vector_store %arg9[%c3_74, %c0_75, %c0_76], %108 {strides = array<i32>} : memref<4x8x8xf32, #tpu.memory_space<vmem>>, vector<1x8x8xf32>,
    } else {
    }
    %c0 = arith.constant 0 : index
    %c0_1 = arith.constant 0 : index
    %c0_2 = arith.constant 0 : index
    %3 = vector.load %arg7[%c0, %c0_1, %c0_2] : memref<4x8x8xf32, #tpu.memory_space<vmem>>, vector<4x8x8xf32>
    %c0_3 = arith.constant 0 : index
    %c0_4 = arith.constant 0 : index
    %c0_5 = arith.constant 0 : index
    %4 = vector.load %arg8[%c0_3, %c0_4, %c0_5] : memref<4x8x8xf32, #tpu.memory_space<vmem>>, vector<4x8x8xf32>
    %c0_6 = arith.constant 0 : index
    %c0_7 = arith.constant 0 : index
    %c0_8 = arith.constant 0 : index
    %5 = vector.load %arg9[%c0_6, %c0_7, %c0_8] : memref<4x8x8xf32, #tpu.memory_space<vmem>>, vector<4x8x8xf32>
    "tpu.trace_start"() <{level = 10 : i32, message = "hqd,hkd->hqk"}> : () -> ()
    %cst = arith.constant dense<0.000000e+00> : vector<4x8x8xf32>
    %6 = tpu.matmul %3, %4, %cst {dimension_numbers = #tpu.dot_dimension_numbers<[2], [2], [1], [1], [0, 0, 0, 1, 1, 1], [0], [0]>} : vector<4x8x8xf32>, vector<4x8x8xf32>, vector<4x8x8xf32> -> vector<4x8x8xf32>
    "tpu.trace_stop"() : () -> ()
    %cst_9 = arith.constant dense<0xFF800000> : vector<4x8xf32>
    %7 = vector.multi_reduction <maximumf>, %6, %cst_9 [2] : vector<4x8x8xf32> to vector<4x8xf32>
    %8 = vector.shape_cast %7 : vector<4x8xf32> to vector<4x8x1xf32>
    %9 = vector.broadcast %8 : vector<4x8x1xf32> to vector<4x8x8xf32>
    %10 = arith.subf %6, %9 : vector<4x8x8xf32>
    %11 = math.exp %10 : vector<4x8x8xf32>
    %cst_10 = arith.constant dense<0.000000e+00> : vector<4x8xf32>
    %12 = vector.multi_reduction <add>, %11, %cst_10 [2] : vector<4x8x8xf32> to vector<4x8xf32>
    %13 = vector.shape_cast %12 : vector<4x8xf32> to vector<4x8x1xf32>
    "tpu.trace_start"() <{level = 10 : i32, message = "hqk,hkd->hqd"}> : () -> ()
    %cst_11 = arith.constant dense<0.000000e+00> : vector<4x8x8xf32>
    %14 = tpu.matmul %11, %5, %cst_11 {dimension_numbers = #tpu.dot_dimension_numbers<[2], [1], [1], [2], [0, 0, 0, 1, 1, 2], [0], [0]>} : vector<4x8x8xf32>, vector<4x8x8xf32>, vector<4x8x8xf32> -> vector<4x8x8xf32>
    "tpu.trace_stop"() : () -> ()
    %15 = tpu.reciprocal %13 : vector<4x8x1xf32> -> vector<4x8x1xf32>
    %16 = vector.broadcast %15 : vector<4x8x1xf32> to vector<4x8x8xf32>
    %17 = arith.mulf %14, %16 : vector<4x8x8xf32>
    %cst_12 = arith.constant 0.000000e+00 : f32
    %18 = vector.broadcast %cst_12 : f32 to vector<8x32xf32>
    %19 = vector.extract_strided_slice %17 {offsets = [0, 0, 0], sizes = [1, 8, 8], strides = [1, 1, 1]} : vector<4x8x8xf32> to vector<1x8x8xf32>
    %20 = vector.shape_cast %19 : vector<1x8x8xf32> to vector<8x8xf32>
    %c0_13 = arith.constant 0 : index
    %c0_14 = arith.constant 0 : index
    %c0_15 = arith.constant 0 : index
    %21 = vector.load %arg4[%c0_13, %c0_14, %c0_15] : memref<4x8x32xf32, #tpu.memory_space<vmem>>, vector<1x8x32xf32>
    %22 = vector.shape_cast %21 : vector<1x8x32xf32> to vector<8x32xf32>
    %cst_16 = arith.constant dense<0.000000e+00> : vector<8x32xf32>
    %23 = tpu.matmul %20, %22, %cst_16 {dimension_numbers = #tpu.dot_dimension_numbers<[1], [0], [0], [1], [0, 0, 1, 1], [], []>} : vector<8x8xf32>, vector<8x32xf32>, vector<8x32xf32> -> vector<8x32xf32>
    %24 = arith.addf %18, %23 : vector<8x32xf32>
    %25 = vector.extract_strided_slice %17 {offsets = [1, 0, 0], sizes = [1, 8, 8], strides = [1, 1, 1]} : vector<4x8x8xf32> to vector<1x8x8xf32>
    %26 = vector.shape_cast %25 : vector<1x8x8xf32> to vector<8x8xf32>
    %c1 = arith.constant 1 : index
    %c0_17 = arith.constant 0 : index
    %c0_18 = arith.constant 0 : index
    %27 = vector.load %arg4[%c1, %c0_17, %c0_18] : memref<4x8x32xf32, #tpu.memory_space<vmem>>, vector<1x8x32xf32>
    %28 = vector.shape_cast %27 : vector<1x8x32xf32> to vector<8x32xf32>
    %cst_19 = arith.constant dense<0.000000e+00> : vector<8x32xf32>
    %29 = tpu.matmul %26, %28, %cst_19 {dimension_numbers = #tpu.dot_dimension_numbers<[1], [0], [0], [1], [0, 0, 1, 1], [], []>} : vector<8x8xf32>, vector<8x32xf32>, vector<8x32xf32> -> vector<8x32xf32>
    %30 = arith.addf %24, %29 : vector<8x32xf32>
    %31 = vector.extract_strided_slice %17 {offsets = [2, 0, 0], sizes = [1, 8, 8], strides = [1, 1, 1]} : vector<4x8x8xf32> to vector<1x8x8xf32>
    %32 = vector.shape_cast %31 : vector<1x8x8xf32> to vector<8x8xf32>
    %c2 = arith.constant 2 : index
    %c0_20 = arith.constant 0 : index
    %c0_21 = arith.constant 0 : index
    %33 = vector.load %arg4[%c2, %c0_20, %c0_21] : memref<4x8x32xf32, #tpu.memory_space<vmem>>, vector<1x8x32xf32>
    %34 = vector.shape_cast %33 : vector<1x8x32xf32> to vector<8x32xf32>
    %cst_22 = arith.constant dense<0.000000e+00> : vector<8x32xf32>
    %35 = tpu.matmul %32, %34, %cst_22 {dimension_numbers = #tpu.dot_dimension_numbers<[1], [0], [0], [1], [0, 0, 1, 1], [], []>} : vector<8x8xf32>, vector<8x32xf32>, vector<8x32xf32> -> vector<8x32xf32>
    %36 = arith.addf %30, %35 : vector<8x32xf32>
    %37 = vector.extract_strided_slice %17 {offsets = [3, 0, 0], sizes = [1, 8, 8], strides = [1, 1, 1]} : vector<4x8x8xf32> to vector<1x8x8xf32>
    %38 = vector.shape_cast %37 : vector<1x8x8xf32> to vector<8x8xf32>
    %c3 = arith.constant 3 : index
    %c0_23 = arith.constant 0 : index
    %c0_24 = arith.constant 0 : index
    %39 = vector.load %arg4[%c3, %c0_23, %c0_24] : memref<4x8x32xf32, #tpu.memory_space<vmem>>, vector<1x8x32xf32>
    %40 = vector.shape_cast %39 : vector<1x8x32xf32> to vector<8x32xf32>
    %cst_25 = arith.constant dense<0.000000e+00> : vector<8x32xf32>
    %41 = tpu.matmul %38, %40, %cst_25 {dimension_numbers = #tpu.dot_dimension_numbers<[1], [0], [0], [1], [0, 0, 1, 1], [], []>} : vector<8x8xf32>, vector<8x32xf32>, vector<8x32xf32> -> vector<8x32xf32>
    %42 = arith.addf %36, %41 : vector<8x32xf32>
    %c0_26 = arith.constant 0 : index
    %c0_27 = arith.constant 0 : index
    %43 = vector.load %arg5[%c0_26, %c0_27] : memref<1x32xf32, #tpu.memory_space<vmem>>, vector<1x32xf32>
    %44 = vector.broadcast %43 : vector<1x32xf32> to vector<8x32xf32>
    %45 = arith.addf %42, %44 : vector<8x32xf32>
    %c0_28 = arith.constant 0 : index
    %c0_29 = arith.constant 0 : index
    %c0_30 = arith.constant 0 : index
    %46 = vector.load %arg6[%c0_28, %c0_29, %c0_30] : memref<1x8x32xf32, #tpu.memory_space<vmem>>, vector<1x8x32xf32>
    %47 = vector.shape_cast %46 : vector<1x8x32xf32> to vector<8x32xf32>
    %48 = vector.shape_cast %45 : vector<8x32xf32> to vector<1x8x32xf32>
    tpu.vector_store %arg6[%c0_28, %c0_29, %c0_30], %48 {strides = array<i32>} : memref<1x8x32xf32, #tpu.memory_space<vmem>>, vector<1x8x32xf32>,
    return
  }
  func.func @transform_0(%arg0: i32, %arg1: i32) -> (i32, i32, i32) {
    %c0_i32 = arith.constant 0 : i32
    %c0_i32_0 = arith.constant 0 : i32
    %c0_i32_1 = arith.constant 0 : i32
    return %arg0, %c0_i32, %c0_i32_0 : i32, i32, i32
  }
  func.func @transform_1(%arg0: i32, %arg1: i32) -> (i32, i32) {
    %c0_i32 = arith.constant 0 : i32
    %c0_i32_0 = arith.constant 0 : i32
    %c0_i32_1 = arith.constant 0 : i32
    return %c0_i32, %c0_i32_0 : i32, i32
  }
  func.func @transform_2(%arg0: i32, %arg1: i32) -> (i32, i32, i32) {
    %c0_i32 = arith.constant 0 : i32
    %c0_i32_0 = arith.constant 0 : i32
    %c0_i32_1 = arith.constant 0 : i32
    %c0_i32_2 = arith.constant 0 : i32
    return %c0_i32, %c0_i32_0, %c0_i32_1 : i32, i32, i32
  }
  func.func @transform_3(%arg0: i32, %arg1: i32) -> (i32, i32) {
    %c0_i32 = arith.constant 0 : i32
    %c0_i32_0 = arith.constant 0 : i32
    %c0_i32_1 = arith.constant 0 : i32
    return %c0_i32, %c0_i32_0 : i32, i32
  }
  func.func @transform_4(%arg0: i32, %arg1: i32) -> (i32, i32, i32) {
    %c0_i32 = arith.constant 0 : i32
    %c0_i32_0 = arith.constant 0 : i32
    return %arg0, %arg1, %c0_i32 : i32, i32, i32
  }
}

module attributes {stable_mosaic.version = 11 : i64} {
  func.func @_mhsa_self_kernel(%arg0: i32, %arg1: i32, %arg2: memref<1x8x32xf32, #tpu.memory_space<vmem>>, %arg3: memref<32x96xf32, #tpu.memory_space<vmem>>, %arg4: memref<4x8x32xf32, #tpu.memory_space<vmem>>, %arg5: memref<1x32xf32, #tpu.memory_space<vmem>>, %arg6: memref<1x8x32xf32, #tpu.memory_space<vmem>>, %arg7: memref<4x8x8xf32, #tpu.memory_space<vmem>>, %arg8: memref<4x8x8xf32, #tpu.memory_space<vmem>>, %arg9: memref<4x8x8xf32, #tpu.memory_space<vmem>>) attributes {dimension_semantics = [#tpu.dimension_semantics<parallel>, #tpu.dimension_semantics<arbitrary>], iteration_bounds = array<i64: 2, 1>, scalar_prefetch = 0 : i64, scratch_operands = 3 : i64, tpu.core_type = #tpu.core_type<tc>, window_params = [{transform_indices = @transform_0, window_bounds = array<i64: 1, 8, 32>}, {pipeline_mode = #tpu.pipeline_mode<synchronous>, transform_indices = @transform_1, window_bounds = array<i64: 32, 96>}, {pipeline_mode = #tpu.pipeline_mode<synchronous>, transform_indices = @transform_2, window_bounds = array<i64: 4, 8, 32>}, {pipeline_mode = #tpu.pipeline_mode<synchronous>, transform_indices = @transform_3, window_bounds = array<i64: 1, 32>}, {transform_indices = @transform_4, window_bounds = array<i64: 1, 8, 32>}]} {
    %c0_i32 = arith.constant 0 : i32
    %0 = arith.cmpi eq, %arg1, %c0_i32 : i32
    %1 = arith.extui %0 : i1 to i32
    %c0_i32_0 = arith.constant 0 : i32
    %2 = arith.cmpi ne, %1, %c0_i32_0 : i32
    scf.if %2 {
      %c0_31 = arith.constant 0 : index
      %c0_32 = arith.constant 0 : index
      %c0_33 = arith.constant 0 : index
      %49 = vector.load %arg2[%c0_31, %c0_32, %c0_33] : memref<1x8x32xf32, #tpu.memory_space<vmem>>, vector<1x8x32xf32>
      %50 = vector.shape_cast %49 : vector<1x8x32xf32> to vector<8x32xf32>
      %c0_34 = arith.constant 0 : index
      %c0_35 = arith.constant 0 : index
      %51 = vector.load %arg3[%c0_34, %c0_35] : memref<32x96xf32, #tpu.memory_space<vmem>>, vector<32x96xf32>
      %cst_36 = arith.constant dense<0.000000e+00> : vector<8x96xf32>
      %52 = tpu.matmul %50, %51, %cst_36 {dimension_numbers = #tpu.dot_dimension_numbers<[1], [0], [0], [1], [0, 0, 1, 1], [], []>} : vector<8x32xf32>, vector<32x96xf32>, vector<8x96xf32> -> vector<8x96xf32>
      %53 = vector.extract_strided_slice %52 {offsets = [0, 0], sizes = [8, 8], strides = [1, 1]} : vector<8x96xf32> to vector<8x8xf32>
      %cst_37 = arith.constant 0.353553385 : f32
      %54 = vector.broadcast %cst_37 : f32 to vector<8x8xf32>
      %55 = arith.mulf %53, %54 : vector<8x8xf32>
      %c0_38 = arith.constant 0 : index
      %c0_39 = arith.constant 0 : index
      %c0_40 = arith.constant 0 : index
      %56 = vector.load %arg7[%c0_38, %c0_39, %c0_40] : memref<4x8x8xf32, #tpu.memory_space<vmem>>, vector<1x8x8xf32>
      %57 = vector.shape_cast %56 : vector<1x8x8xf32> to vector<8x8xf32>
      %58 = vector.shape_cast %55 : vector<8x8xf32> to vector<1x8x8xf32>
      tpu.vector_store %arg7[%c0_38, %c0_39, %c0_40], %58 {strides = array<i32>} : memref<4x8x8xf32, #tpu.memory_space<vmem>>, vector<1x8x8xf32>,
      %59 = vector.extract_strided_slice %52 {offsets = [0, 8], sizes = [8, 8], strides = [1, 1]} : vector<8x96xf32> to vector<8x8xf32>
      %cst_41 = arith.constant 0.353553385 : f32
      %60 = vector.broadcast %cst_41 : f32 to vector<8x8xf32>
      %61 = arith.mulf %59, %60 : vector<8x8xf32>
      %c1_42 = arith.constant 1 : index
      %c0_43 = arith.constant 0 : index
      %c0_44 = arith.constant 0 : index
      %62 = vector.load %arg7[%c1_42, %c0_43, %c0_44] : memref<4x8x8xf32, #tpu.memory_space<vmem>>, vector<1x8x8xf32>
      %63 = vector.shape_cast %62 : vector<1x8x8xf32> to vector<8x8xf32>
      %64 = vector.shape_cast %61 : vector<8x8xf32> to vector<1x8x8xf32>
      tpu.vector_store %arg7[%c1_42, %c0_43, %c0_44], %64 {strides = array<i32>} : memref<4x8x8xf32, #tpu.memory_space<vmem>>, vector<1x8x8xf32>,
      %65 = vector.extract_strided_slice %52 {offsets = [0, 16], sizes = [8, 8], strides = [1, 1]} : vector<8x96xf32> to vector<8x8xf32>
      %cst_45 = arith.constant 0.353553385 : f32
      %66 = vector.broadcast %cst_45 : f32 to vector<8x8xf32>
      %67 = arith.mulf %65, %66 : vector<8x8xf32>
      %c2_46 = arith.constant 2 : index
      %c0_47 = arith.constant 0 : index
      %c0_48 = arith.constant 0 : index
      %68 = vector.load %arg7[%c2_46, %c0_47, %c0_48] : memref<4x8x8xf32, #tpu.memory_space<vmem>>, vector<1x8x8xf32>
      %69 = vector.shape_cast %68 : vector<1x8x8xf32> to vector<8x8xf32>
      %70 = vector.shape_cast %67 : vector<8x8xf32> to vector<1x8x8xf32>
      tpu.vector_store %arg7[%c2_46, %c0_47, %c0_48], %70 {strides = array<i32>} : memref<4x8x8xf32, #tpu.memory_space<vmem>>, vector<1x8x8xf32>,
      %71 = vector.extract_strided_slice %52 {offsets = [0, 24], sizes = [8, 8], strides = [1, 1]} : vector<8x96xf32> to vector<8x8xf32>
      %cst_49 = arith.constant 0.353553385 : f32
      %72 = vector.broadcast %cst_49 : f32 to vector<8x8xf32>
      %73 = arith.mulf %71, %72 : vector<8x8xf32>
      %c3_50 = arith.constant 3 : index
      %c0_51 = arith.constant 0 : index
      %c0_52 = arith.constant 0 : index
      %74 = vector.load %arg7[%c3_50, %c0_51, %c0_52] : memref<4x8x8xf32, #tpu.memory_space<vmem>>, vector<1x8x8xf32>
      %75 = vector.shape_cast %74 : vector<1x8x8xf32> to vector<8x8xf32>
      %76 = vector.shape_cast %73 : vector<8x8xf32> to vector<1x8x8xf32>
      tpu.vector_store %arg7[%c3_50, %c0_51, %c0_52], %76 {strides = array<i32>} : memref<4x8x8xf32, #tpu.memory_space<vmem>>, vector<1x8x8xf32>,
      %77 = vector.extract_strided_slice %52 {offsets = [0, 32], sizes = [8, 8], strides = [1, 1]} : vector<8x96xf32> to vector<8x8xf32>
      %c0_53 = arith.constant 0 : index
      %c0_54 = arith.constant 0 : index
      %c0_55 = arith.constant 0 : index
      %78 = vector.load %arg8[%c0_53, %c0_54, %c0_55] : memref<4x8x8xf32, #tpu.memory_space<vmem>>, vector<1x8x8xf32>
      %79 = vector.shape_cast %78 : vector<1x8x8xf32> to vector<8x8xf32>
      %80 = vector.shape_cast %77 : vector<8x8xf32> to vector<1x8x8xf32>
      tpu.vector_store %arg8[%c0_53, %c0_54, %c0_55], %80 {strides = array<i32>} : memref<4x8x8xf32, #tpu.memory_space<vmem>>, vector<1x8x8xf32>,
      %81 = vector.extract_strided_slice %52 {offsets = [0, 40], sizes = [8, 8], strides = [1, 1]} : vector<8x96xf32> to vector<8x8xf32>
      %c1_56 = arith.constant 1 : index
      %c0_57 = arith.constant 0 : index
      %c0_58 = arith.constant 0 : index
      %82 = vector.load %arg8[%c1_56, %c0_57, %c0_58] : memref<4x8x8xf32, #tpu.memory_space<vmem>>, vector<1x8x8xf32>
      %83 = vector.shape_cast %82 : vector<1x8x8xf32> to vector<8x8xf32>
      %84 = vector.shape_cast %81 : vector<8x8xf32> to vector<1x8x8xf32>
      tpu.vector_store %arg8[%c1_56, %c0_57, %c0_58], %84 {strides = array<i32>} : memref<4x8x8xf32, #tpu.memory_space<vmem>>, vector<1x8x8xf32>,
      %85 = vector.extract_strided_slice %52 {offsets = [0, 48], sizes = [8, 8], strides = [1, 1]} : vector<8x96xf32> to vector<8x8xf32>
      %c2_59 = arith.constant 2 : index
      %c0_60 = arith.constant 0 : index
      %c0_61 = arith.constant 0 : index
      %86 = vector.load %arg8[%c2_59, %c0_60, %c0_61] : memref<4x8x8xf32, #tpu.memory_space<vmem>>, vector<1x8x8xf32>
      %87 = vector.shape_cast %86 : vector<1x8x8xf32> to vector<8x8xf32>
      %88 = vector.shape_cast %85 : vector<8x8xf32> to vector<1x8x8xf32>
      tpu.vector_store %arg8[%c2_59, %c0_60, %c0_61], %88 {strides = array<i32>} : memref<4x8x8xf32, #tpu.memory_space<vmem>>, vector<1x8x8xf32>,
      %89 = vector.extract_strided_slice %52 {offsets = [0, 56], sizes = [8, 8], strides = [1, 1]} : vector<8x96xf32> to vector<8x8xf32>
      %c3_62 = arith.constant 3 : index
      %c0_63 = arith.constant 0 : index
      %c0_64 = arith.constant 0 : index
      %90 = vector.load %arg8[%c3_62, %c0_63, %c0_64] : memref<4x8x8xf32, #tpu.memory_space<vmem>>, vector<1x8x8xf32>
      %91 = vector.shape_cast %90 : vector<1x8x8xf32> to vector<8x8xf32>
      %92 = vector.shape_cast %89 : vector<8x8xf32> to vector<1x8x8xf32>
      tpu.vector_store %arg8[%c3_62, %c0_63, %c0_64], %92 {strides = array<i32>} : memref<4x8x8xf32, #tpu.memory_space<vmem>>, vector<1x8x8xf32>,
      %93 = vector.extract_strided_slice %52 {offsets = [0, 64], sizes = [8, 8], strides = [1, 1]} : vector<8x96xf32> to vector<8x8xf32>
      %c0_65 = arith.constant 0 : index
      %c0_66 = arith.constant 0 : index
      %c0_67 = arith.constant 0 : index
      %94 = vector.load %arg9[%c0_65, %c0_66, %c0_67] : memref<4x8x8xf32, #tpu.memory_space<vmem>>, vector<1x8x8xf32>
      %95 = vector.shape_cast %94 : vector<1x8x8xf32> to vector<8x8xf32>
      %96 = vector.shape_cast %93 : vector<8x8xf32> to vector<1x8x8xf32>
      tpu.vector_store %arg9[%c0_65, %c0_66, %c0_67], %96 {strides = array<i32>} : memref<4x8x8xf32, #tpu.memory_space<vmem>>, vector<1x8x8xf32>,
      %97 = vector.extract_strided_slice %52 {offsets = [0, 72], sizes = [8, 8], strides = [1, 1]} : vector<8x96xf32> to vector<8x8xf32>
      %c1_68 = arith.constant 1 : index
      %c0_69 = arith.constant 0 : index
      %c0_70 = arith.constant 0 : index
      %98 = vector.load %arg9[%c1_68, %c0_69, %c0_70] : memref<4x8x8xf32, #tpu.memory_space<vmem>>, vector<1x8x8xf32>
      %99 = vector.shape_cast %98 : vector<1x8x8xf32> to vector<8x8xf32>
      %100 = vector.shape_cast %97 : vector<8x8xf32> to vector<1x8x8xf32>
      tpu.vector_store %arg9[%c1_68, %c0_69, %c0_70], %100 {strides = array<i32>} : memref<4x8x8xf32, #tpu.memory_space<vmem>>, vector<1x8x8xf32>,
      %101 = vector.extract_strided_slice %52 {offsets = [0, 80], sizes = [8, 8], strides = [1, 1]} : vector<8x96xf32> to vector<8x8xf32>
      %c2_71 = arith.constant 2 : index
      %c0_72 = arith.constant 0 : index
      %c0_73 = arith.constant 0 : index
      %102 = vector.load %arg9[%c2_71, %c0_72, %c0_73] : memref<4x8x8xf32, #tpu.memory_space<vmem>>, vector<1x8x8xf32>
      %103 = vector.shape_cast %102 : vector<1x8x8xf32> to vector<8x8xf32>
      %104 = vector.shape_cast %101 : vector<8x8xf32> to vector<1x8x8xf32>
      tpu.vector_store %arg9[%c2_71, %c0_72, %c0_73], %104 {strides = array<i32>} : memref<4x8x8xf32, #tpu.memory_space<vmem>>, vector<1x8x8xf32>,
      %105 = vector.extract_strided_slice %52 {offsets = [0, 88], sizes = [8, 8], strides = [1, 1]} : vector<8x96xf32> to vector<8x8xf32>
      %c3_74 = arith.constant 3 : index
      %c0_75 = arith.constant 0 : index
      %c0_76 = arith.constant 0 : index
      %106 = vector.load %arg9[%c3_74, %c0_75, %c0_76] : memref<4x8x8xf32, #tpu.memory_space<vmem>>, vector<1x8x8xf32>
      %107 = vector.shape_cast %106 : vector<1x8x8xf32> to vector<8x8xf32>
      %108 = vector.shape_cast %105 : vector<8x8xf32> to vector<1x8x8xf32>
      tpu.vector_store %arg9[%c3_74, %c0_75, %c0_76], %108 {strides = array<i32>} : memref<4x8x8xf32, #tpu.memory_space<vmem>>, vector<1x8x8xf32>,
    } else {
    }
    %c0 = arith.constant 0 : index
    %c0_1 = arith.constant 0 : index
    %c0_2 = arith.constant 0 : index
    %3 = vector.load %arg7[%c0, %c0_1, %c0_2] : memref<4x8x8xf32, #tpu.memory_space<vmem>>, vector<4x8x8xf32>
    %c0_3 = arith.constant 0 : index
    %c0_4 = arith.constant 0 : index
    %c0_5 = arith.constant 0 : index
    %4 = vector.load %arg8[%c0_3, %c0_4, %c0_5] : memref<4x8x8xf32, #tpu.memory_space<vmem>>, vector<4x8x8xf32>
    %c0_6 = arith.constant 0 : index
    %c0_7 = arith.constant 0 : index
    %c0_8 = arith.constant 0 : index
    %5 = vector.load %arg9[%c0_6, %c0_7, %c0_8] : memref<4x8x8xf32, #tpu.memory_space<vmem>>, vector<4x8x8xf32>
    "tpu.trace_start"() <{level = 10 : i32, message = "hqd,hkd->hqk"}> : () -> ()
    %cst = arith.constant dense<0.000000e+00> : vector<4x8x8xf32>
    %6 = tpu.matmul %3, %4, %cst {dimension_numbers = #tpu.dot_dimension_numbers<[2], [2], [1], [1], [0, 0, 0, 1, 1, 1], [0], [0]>} : vector<4x8x8xf32>, vector<4x8x8xf32>, vector<4x8x8xf32> -> vector<4x8x8xf32>
    "tpu.trace_stop"() : () -> ()
    %cst_9 = arith.constant dense<0xFF800000> : vector<4x8xf32>
    %7 = vector.multi_reduction <maximumf>, %6, %cst_9 [2] : vector<4x8x8xf32> to vector<4x8xf32>
    %8 = vector.shape_cast %7 : vector<4x8xf32> to vector<4x8x1xf32>
    %9 = vector.broadcast %8 : vector<4x8x1xf32> to vector<4x8x8xf32>
    %10 = arith.subf %6, %9 : vector<4x8x8xf32>
    %11 = math.exp %10 : vector<4x8x8xf32>
    %cst_10 = arith.constant dense<0.000000e+00> : vector<4x8xf32>
    %12 = vector.multi_reduction <add>, %11, %cst_10 [2] : vector<4x8x8xf32> to vector<4x8xf32>
    %13 = vector.shape_cast %12 : vector<4x8xf32> to vector<4x8x1xf32>
    "tpu.trace_start"() <{level = 10 : i32, message = "hqk,hkd->hqd"}> : () -> ()
    %cst_11 = arith.constant dense<0.000000e+00> : vector<4x8x8xf32>
    %14 = tpu.matmul %11, %5, %cst_11 {dimension_numbers = #tpu.dot_dimension_numbers<[2], [1], [1], [2], [0, 0, 0, 1, 1, 2], [0], [0]>} : vector<4x8x8xf32>, vector<4x8x8xf32>, vector<4x8x8xf32> -> vector<4x8x8xf32>
    "tpu.trace_stop"() : () -> ()
    %15 = tpu.reciprocal %13 : vector<4x8x1xf32> -> vector<4x8x1xf32>
    %16 = vector.broadcast %15 : vector<4x8x1xf32> to vector<4x8x8xf32>
    %17 = arith.mulf %14, %16 : vector<4x8x8xf32>
    %cst_12 = arith.constant 0.000000e+00 : f32
    %18 = vector.broadcast %cst_12 : f32 to vector<8x32xf32>
    %19 = vector.extract_strided_slice %17 {offsets = [0, 0, 0], sizes = [1, 8, 8], strides = [1, 1, 1]} : vector<4x8x8xf32> to vector<1x8x8xf32>
    %20 = vector.shape_cast %19 : vector<1x8x8xf32> to vector<8x8xf32>
    %c0_13 = arith.constant 0 : index
    %c0_14 = arith.constant 0 : index
    %c0_15 = arith.constant 0 : index
    %21 = vector.load %arg4[%c0_13, %c0_14, %c0_15] : memref<4x8x32xf32, #tpu.memory_space<vmem>>, vector<1x8x32xf32>
    %22 = vector.shape_cast %21 : vector<1x8x32xf32> to vector<8x32xf32>
    %cst_16 = arith.constant dense<0.000000e+00> : vector<8x32xf32>
    %23 = tpu.matmul %20, %22, %cst_16 {dimension_numbers = #tpu.dot_dimension_numbers<[1], [0], [0], [1], [0, 0, 1, 1], [], []>} : vector<8x8xf32>, vector<8x32xf32>, vector<8x32xf32> -> vector<8x32xf32>
    %24 = arith.addf %18, %23 : vector<8x32xf32>
    %25 = vector.extract_strided_slice %17 {offsets = [1, 0, 0], sizes = [1, 8, 8], strides = [1, 1, 1]} : vector<4x8x8xf32> to vector<1x8x8xf32>
    %26 = vector.shape_cast %25 : vector<1x8x8xf32> to vector<8x8xf32>
    %c1 = arith.constant 1 : index
    %c0_17 = arith.constant 0 : index
    %c0_18 = arith.constant 0 : index
    %27 = vector.load %arg4[%c1, %c0_17, %c0_18] : memref<4x8x32xf32, #tpu.memory_space<vmem>>, vector<1x8x32xf32>
    %28 = vector.shape_cast %27 : vector<1x8x32xf32> to vector<8x32xf32>
    %cst_19 = arith.constant dense<0.000000e+00> : vector<8x32xf32>
    %29 = tpu.matmul %26, %28, %cst_19 {dimension_numbers = #tpu.dot_dimension_numbers<[1], [0], [0], [1], [0, 0, 1, 1], [], []>} : vector<8x8xf32>, vector<8x32xf32>, vector<8x32xf32> -> vector<8x32xf32>
    %30 = arith.addf %24, %29 : vector<8x32xf32>
    %31 = vector.extract_strided_slice %17 {offsets = [2, 0, 0], sizes = [1, 8, 8], strides = [1, 1, 1]} : vector<4x8x8xf32> to vector<1x8x8xf32>
    %32 = vector.shape_cast %31 : vector<1x8x8xf32> to vector<8x8xf32>
    %c2 = arith.constant 2 : index
    %c0_20 = arith.constant 0 : index
    %c0_21 = arith.constant 0 : index
    %33 = vector.load %arg4[%c2, %c0_20, %c0_21] : memref<4x8x32xf32, #tpu.memory_space<vmem>>, vector<1x8x32xf32>
    %34 = vector.shape_cast %33 : vector<1x8x32xf32> to vector<8x32xf32>
    %cst_22 = arith.constant dense<0.000000e+00> : vector<8x32xf32>
    %35 = tpu.matmul %32, %34, %cst_22 {dimension_numbers = #tpu.dot_dimension_numbers<[1], [0], [0], [1], [0, 0, 1, 1], [], []>} : vector<8x8xf32>, vector<8x32xf32>, vector<8x32xf32> -> vector<8x32xf32>
    %36 = arith.addf %30, %35 : vector<8x32xf32>
    %37 = vector.extract_strided_slice %17 {offsets = [3, 0, 0], sizes = [1, 8, 8], strides = [1, 1, 1]} : vector<4x8x8xf32> to vector<1x8x8xf32>
    %38 = vector.shape_cast %37 : vector<1x8x8xf32> to vector<8x8xf32>
    %c3 = arith.constant 3 : index
    %c0_23 = arith.constant 0 : index
    %c0_24 = arith.constant 0 : index
    %39 = vector.load %arg4[%c3, %c0_23, %c0_24] : memref<4x8x32xf32, #tpu.memory_space<vmem>>, vector<1x8x32xf32>
    %40 = vector.shape_cast %39 : vector<1x8x32xf32> to vector<8x32xf32>
    %cst_25 = arith.constant dense<0.000000e+00> : vector<8x32xf32>
    %41 = tpu.matmul %38, %40, %cst_25 {dimension_numbers = #tpu.dot_dimension_numbers<[1], [0], [0], [1], [0, 0, 1, 1], [], []>} : vector<8x8xf32>, vector<8x32xf32>, vector<8x32xf32> -> vector<8x32xf32>
    %42 = arith.addf %36, %41 : vector<8x32xf32>
    %c0_26 = arith.constant 0 : index
    %c0_27 = arith.constant 0 : index
    %43 = vector.load %arg5[%c0_26, %c0_27] : memref<1x32xf32, #tpu.memory_space<vmem>>, vector<1x32xf32>
    %44 = vector.broadcast %43 : vector<1x32xf32> to vector<8x32xf32>
    %45 = arith.addf %42, %44 : vector<8x32xf32>
    %c0_28 = arith.constant 0 : index
    %c0_29 = arith.constant 0 : index
    %c0_30 = arith.constant 0 : index
    %46 = vector.load %arg6[%c0_28, %c0_29, %c0_30] : memref<1x8x32xf32, #tpu.memory_space<vmem>>, vector<1x8x32xf32>
    %47 = vector.shape_cast %46 : vector<1x8x32xf32> to vector<8x32xf32>
    %48 = vector.shape_cast %45 : vector<8x32xf32> to vector<1x8x32xf32>
    tpu.vector_store %arg6[%c0_28, %c0_29, %c0_30], %48 {strides = array<i32>} : memref<1x8x32xf32, #tpu.memory_space<vmem>>, vector<1x8x32xf32>,
    return
  }
  func.func @transform_0(%arg0: i32, %arg1: i32) -> (i32, i32, i32) {
    %c0_i32 = arith.constant 0 : i32
    %c0_i32_0 = arith.constant 0 : i32
    %c0_i32_1 = arith.constant 0 : i32
    return %arg0, %c0_i32, %c0_i32_0 : i32, i32, i32
  }
  func.func @transform_1(%arg0: i32, %arg1: i32) -> (i32, i32) {
    %c0_i32 = arith.constant 0 : i32
    %c0_i32_0 = arith.constant 0 : i32
    %c0_i32_1 = arith.constant 0 : i32
    return %c0_i32, %c0_i32_0 : i32, i32
  }
  func.func @transform_2(%arg0: i32, %arg1: i32) -> (i32, i32, i32) {
    %c0_i32 = arith.constant 0 : i32
    %c0_i32_0 = arith.constant 0 : i32
    %c0_i32_1 = arith.constant 0 : i32
    %c0_i32_2 = arith.constant 0 : i32
    return %c0_i32, %c0_i32_0, %c0_i32_1 : i32, i32, i32
  }
  func.func @transform_3(%arg0: i32, %arg1: i32) -> (i32, i32) {
    %c0_i32 = arith.constant 0 : i32
    %c0_i32_0 = arith.constant 0 : i32
    %c0_i32_1 = arith.constant 0 : i32
    return %c0_i32, %c0_i32_0 : i32, i32
  }
  func.func @transform_4(%arg0: i32, %arg1: i32) -> (i32, i32, i32) {
    %c0_i32 = arith.constant 0 : i32
    %c0_i32_0 = arith.constant 0 : i32
    return %arg0, %arg1, %c0_i32 : i32, i32, i32
  }
}

</mosaic_0001>

<bundles_post_ra>
// kernel: tpu_custom_call.1
= control target key start
LH: loop header
LB: loop body
LE: loop exit
PB: predicated region body
PF: predicated region fallthrough
CT: control target
= control target key end

     0   :  { %9 = vsyncpa [#allocation6], 0  ;;  %s2205_s0 = inlined_call_operand.hbm [shape: f32[2,8,32], index: 0, kind: input, shape index: {}]   ;;  %s2206_s1 = inlined_call_operand.hbm [shape: f32[32,96], index: 1, kind: input, shape index: {}]   ;;  %s2207_s2 = inlined_call_operand.hbm [shape: f32[4,8,32], index: 2, kind: input, shape index: {}]   ;;  %s2208_s3 = inlined_call_operand.vmem [shape: f32[1,32], index: 3, kind: input, shape index: {}]   ;;  %s2209_s4 = inlined_call_operand.hbm [shape: f32[2,8,32], index: 4, kind: output, shape index: {}]  }
   0x1   :  { %11 = vsyncpa [#allocation6 + $0x1], 0 }
   0x2   :  { %12 = vsyncpa [#allocation9], 0 }
   0x3   :  { %13 = vsyncpa [#allocation7], 0 }
   0x4   :  { %15 = vsyncpa [#allocation7 + $0x1], 0  ;;  %s1933_s15 = smov 0   ;;  %s1935_s16 = smov 0  }
   0x5   :  { %s1937_s17 = smov 0   ;;  %s1939_s18 = smov 0  }
   0x6   :  { %s1941_s19 = smov 0   ;;  %s1943_s20 = smov 0  }
   0x7 LB: > { %s1474_s21 = sadd.s32 4294967295, %s1887_s20   ;;  %s1475_s22 = sadd.s32 4294967294, %s1887_s20   ;;  %s1887_s20 = sphi %s1943_s20, %s21_s20   ;;  %s1883_s19 = sphi %s1941_s19, %s2229_s19   ;;  %s1879_s18 = sphi %s1939_s18, %s2228_s18   ;;  %s1875_s17 = sphi %s1937_s17, %s2227_s17   ;;  %s1871_s16 = sphi %s1935_s16, %s2226_s16   ;;  %s1867_s15 = sphi %s1933_s15, %s2225_s15  }
   0x8   : > { %p53_p0 = scmp.ne.s32.totalorder %s1871_s16, %s1867_s15  ;;  %p1967_p1 = scmp.eq.s32.totalorder %s1474_s21, 0 }
   0x9   : > { %p1971_p2 = scmp.eq.s32.totalorder %s1474_s21, 1  ;;  %p148_p3 = scmp.eq.s32.totalorder %s1475_s22, 1 }
   0xa   : > { %s2213_s23 = scalar_select %p1967_p1, 1, 0 }
   0xb   : > { %p1977_p4 = por %p1967_p1, %p53_p0  ;;  %p1476_p5 = scmp.ge.s32.totalorder %s1887_s20, 1 }
   0xc   : > { %p1982_p6 = por %p148_p3, %p53_p0  ;;  %p155_p7 = scmp.lt.s32.totalorder %s1887_s20, 3 }
   0xd   : > { %s2215_s25 = scalar_select %p1977_p4, 1, 0 }
   0xe   : > { %s2216_s26 = scalar_select %p1982_p6, 1, 0 }
   0xf   : > { %p1987_p8 = pnand %p1476_p5, %p155_p7  ;;  %s1889_s28 = smov [#allocation8]  }
  0x10   : > { %s167_s29 = sshll.u32 %s1889_s28, 4  ;;  %s1890_s5 = smov [#allocation10]   ;;  %s168_s29 = int_to_ptr.vmem [resolvable:$true] %s167_s29 }
  0x11   : > { %p1621_p9 = pneg %p1987_p8  ;;  %s180_s6 = sshll.u32 %s1890_s5, 4  ;;  %s181_s6 = int_to_ptr.vmem [resolvable:$true] %s180_s6 }
  0x12   : > { %s1734_s7 = scalar_lea.vmem %s168_s29, 512  ;;  %p1742_p5 = scmp.lt.s32.totalorder %s168_s29, %s168_s29 }
  0x13   : > { %p1996_p11 = pnand %p1621_p9, %p1967_p1  ;;  %p1735_p13 = scmp.ne.s32.totalorder %s168_s29, %s1734_s7 }
  0x14   : > { %p1743_p7 = scmp.lt.s32.totalorder %s1734_s7, %s1734_s7 }
  0x15   : > { %p1725_p12 = pneg %p1996_p11 }
  0x16   : > { %p1744_p10 = por %p1743_p7, %p1742_p5 }
  0x17   : > { %p1737_p0 = pnand %p1735_p13, %p1725_p12 }
  0x19   : > { %p1738_p3 = pneg %p1737_p0 }
  0x1b   : > { %p1745_p9 = pnand %p1744_p10, %p1738_p3 }
  0x1d   : > { %1748 = shalt.err (!%p1745_p9)
}
  0x1e   : > { %s1891_s8 = smov 128   ;;  %s1892_s9 = smov 8  }
  0x1f   : > { %1624 = dma.hbm_to_vmem [thread:$0]  (!%p1996_p11), %s2206_s1, 512, %s168_s29, [#allocation9], %s1891_s8, %s1891_s8, %s1892_s9  }
  0x20   : > { %s1760_s12 = scalar_lea.vmem %s181_s6, 512  ;;  %p1768_p1 = scmp.lt.s32.totalorder %s181_s6, %s181_s6 }
  0x21   : > { %p1761_p6 = scmp.ne.s32.totalorder %s181_s6, %s1760_s12  ;;  %p1769_p4 = scmp.lt.s32.totalorder %s1760_s12, %s1760_s12 }
  0x23   : > { %p1763_p13 = pnand %p1761_p6, %p1725_p12  ;;  %p1770_p5 = por %p1769_p4, %p1768_p1 }
  0x25   : > { %p1764_p0 = pneg %p1763_p13 }
  0x27   : > { %p1771_p10 = pnand %p1770_p5, %p1764_p0 }
  0x29   : > { %1774 = shalt.err (!%p1771_p10)
}
  0x2a   : > { %1627 = dma.hbm_to_vmem [thread:$0]  (!%p1996_p11), %s2207_s2, 512, %s181_s6, [#allocation9], %s1891_s8, %s1891_s8, %s1892_s9  }
  0x2b   : > { %s33_s21 = sadd.s32 1, %s1883_s19  ;;  %s40_s22 = sadd.s32 1, %s1875_s17 }
  0x2c   : > { %p35_p1 = scmp.ge.s32.totalorder %s33_s21, 2  ;;  %p47_p4 = scmp.ne.s32.totalorder %s1875_s17, %s1871_s16 }
  0x2d   : > { %p48_p6 = scmp.eq.s32.totalorder %s1887_s20, 0  ;;  %p1638_p12 = scmp.lt.s32.totalorder %s1887_s20, 2 }
  0x2e   : > { %s2231_s21 = smov (%p35_p1, %s33_s21), 0  ;;  %p2028_p7 = por %p1971_p2, %p47_p4 }
  0x2f   : > { %p49_p3 = por %p48_p6, %p47_p4  ;;  %s37_s29 = ssub.s32 %s1883_s19, %s2231_s21 }
  0x30   : > { %s197_s30 = sand.u32 1, %s1875_s17   ;;  %p38_p9 = scmp.eq.s32.totalorder %s37_s29, 0 }
  0x31   : > { %s1480_s5 = sshll.u32 %s197_s30, 3  ;;  %s1481_s6 = sshll.u32 %s1883_s19, 7 }
  0x32   : > { %s2037_s7 = scalar_select %p38_p9, %s1875_s17, %s40_s22  }
  0x33   : > { %s206_s10 = scalar_lea.hbm %s2205_s0, %s1481_s6  ;;  %s201_s11 = scalar_lea.vmem [#allocation5], %s1480_s5 }
  0x34   : > { %s208_s12 = sshll.u32 %s201_s11, 4  ;;  %p2044_p11 = pnand %p1638_p12, %p49_p3  ;;  %s209_s12 = int_to_ptr.vmem [resolvable:$true] %s208_s12 }
  0x35   : > { %s198_s13 = scalar_lea.sflag [#allocation6], %s197_s30  ;;  %s1788_s14 = scalar_lea.vmem %s209_s12, 128 }
  0x36   : > { %p1777_p2 = pneg %p2044_p11  ;;  %p1789_p13 = scmp.ne.s32.totalorder %s209_s12, %s1788_s14 }
  0x37   : > { %s1893_s22 = smov [#allocation5]  }
  0x38   : > { %p1791_p0 = pnand %p1789_p13, %p1777_p2  ;;  %s1793_s29 = sshll.u32 %s1893_s22, 4  ;;  %s1794_s29 = int_to_ptr.vmem [resolvable:$false] %s1793_s29 }
  0x39   : > { %s1795_s6 = scalar_lea.vmem %s1794_s29, 256  ;;  %p1796_p10 = scmp.lt.s32.totalorder %s209_s12, %s1794_s29 }
  0x3a   : > { %p1792_p5 = pneg %p1791_p0  ;;  %p1797_p1 = scmp.lt.s32.totalorder %s1795_s6, %s1788_s14 }
  0x3c   : > { %p1798_p4 = por %p1797_p1, %p1796_p10 }
  0x3e   : > { %p1799_p6 = pnand %p1798_p4, %p1792_p5 }
  0x40   : > { %1802 = shalt.err (!%p1799_p6)
}
  0x41   : > { %1631 = dma.hbm_to_vmem [thread:$0]  (!%p2044_p11), %s206_s10, 128, %s209_s12, %s198_s13  }
  0x42   : > { %217 = sbr.rel (%p1987_p8) target bundleno = 1174 (0x496), region = 36  ;;  %s2055_s30 = sand.u32 (!%p1987_p8), 1, %s1871_s16  }
  0x43   : > { %s1483_s5 = sshll.u32 (!%p1987_p8), %s2055_s30, 3  ;;  %s220_s8 = scalar_lea.sflag (!%p1987_p8), [#allocation6], %s2055_s30 }
  0x44   : > { %s223_s9 = scalar_lea.vmem (!%p1987_p8), [#allocation5], %s1483_s5  ;;  %p2221_p12 = scmp.ne.s32.totalorder (!%p1987_p8), %s2215_s25, 0 }
  0x47   : > { %1854 = dma.done.wait (%p2221_p12), %s220_s8, 128  }
  0x48   : > { %1856 = vsyncadd (%p2221_p12), %s220_s8, 4294967168  ;;  %p2222_p3 = scmp.ne.s32.totalorder %s2213_s23, 0 }
  0x4a   : > { %1858 = dma.done.wait (%p2222_p3), [#allocation9], 1024  }
  0x4b   : > { %1860 = vsyncadd (%p2222_p3), [#allocation9], 4294966272  ;;  %v1894_v0 = vmov 0.0   ;;  %vm1895_vm0 = vmmov 0   ;;  %v264_v1 = vld [vmem:[#allocation8 + $0x18] sm:$0xff]  ;;  %v263_v2 = vld [vmem:[#allocation8 + $0x10] sm:$0xff] }
  0x4c   : > { %1538 = vmatprep.subr.mxu0 %v1894_v0  ;;  %1546 = vmatprep.mubr.msk.f32.mxu0 %vm1895_vm0, %v1894_v0  ;;  %v262_v3 = vld [vmem:[#allocation8 + $0x8] sm:$0xff]  ;;  %v261_v4 = vld [vmem:[#allocation8] sm:$0xff]  ;;  %v260_v5 = vld [vmem:[%s223_s9] sm:$0xff]  ;;  %vm265_vm1 = vcmask 261120   ;;  %vm340_vm2 = vcmask 64512   ;;  %s1896_s23 = smov 80  }
  0x4d   : > { %1549 = vmatprep.subr.mxu1 %v1894_v0  ;;  %1551 = vmatprep.mubr.msk.f32.mxu1 %vm1895_vm0, %v1894_v0  ;;  %s1897_s25 = smov 96   ;;  %s1898_s27 = smov 88  }
  0x4e   : > { %1539 = vmatpush3.msra.mxu0 %v264_v1  ;;  %s1899_s10 = smov 120   ;;  %s1900_s11 = smov 72   ;;  %v1050_v1 = vld [vmem:[#allocation10] sm:$0xff] }
  0x4f   : > { %1540 = vmatprep.subr.mxu0 %v1894_v0  ;;  %s1901_s12 = smov 112   ;;  %s1902_s24 = smov 104  }
  0x50   : > { %1541 = vmatpush3.msra.mxu0 %v263_v2  ;;  %s1903_s13 = smov 56   ;;  %s1904_s14 = smov 64   ;;  %v1052_v2 = vld [vmem:[#allocation10 + $0x8] sm:$0xff] }
  0x51   : > { %1542 = vmatprep.subr.mxu0 %v1894_v0  ;;  %s1905_s22 = smov 48   ;;  %s1906_s29 = smov 40  }
  0x52   : > { %1543 = vmatpush3.msra.mxu0 %v262_v3  ;;  %s1506_s9 = sshll.u32 %s1879_s18, 7 }
  0x53   : > { %1544 = vmatprep.subr.mxu0 %v1894_v0 }
  0x54   : > { %1545 = vmatpush3.msra.mxu0 %v261_v4 }
  0x55   : > { %1547 = vmatmul.mubr.msk.f32.vlgmr.msra.gmra.mxu0 %vm265_vm1, %v260_v5  ;;  %1559 = vmatprep.subr.mxu0 %v1894_v0 }
  0x56   : > { %1561 = vmatprep.mubr.msk.f32.mxu0 %vm1895_vm0, %v1894_v0 }
 0x115   : > { %v2082_v6 = vpop.f32.mrf.mxu0 }
 0x116   : > { %368 = vrot.lane.b32.xlu1 %v2082_v6, %s1896_s23  ;;  %359 = vrot.lane.b32.xlu0 %v2082_v6, %s1897_s25  ;;  %v339_v7 = vmul.f32 0.35355338, %v2082_v6  ;;  %s255_s23 = scalar_lea.vmem [#allocation11], %s1483_s5 }
 0x117   : > { %v1548_v8 = vpop.f32.mrf.mxu0  ;;  %s1376_s25 = sshll.u32 %s255_s23, 4  ;;  %s1377_s25 = int_to_ptr.vmem [resolvable:$true] %s1376_s25 }
 0x118   : > { %341 = vst.msk [vmem:[#allocation2] sm:$0xff] %vm340_vm2, %v339_v7 }
 0x11a   : > { %363 = vrot.lane.b32.xlu0 %v2082_v6, %s1898_s27  ;;  %343 = vrot.lane.b32.xlu1 %v339_v7, %s1899_s10 }
 0x11e   : > { %373 = vrot.lane.b32.xlu0 %v2082_v6, %s1900_s11  ;;  %348 = vrot.lane.b32.xlu1 %v339_v7, %s1901_s12  ;;  %s1374_s11 = scalar_lea.hbm %s2209_s4, %s1506_s9  ;;  %s1362_s12 = scalar_lea.sflag [#allocation7], %s2055_s30 }
 0x11f   : > { %v397_v17 = vld [vmem:[#allocation2] sm:$0xff] }
 0x122   : > { %353 = vrot.lane.b32.xlu0 %v339_v7, %s1902_s24  ;;  %382 = vrot.lane.b32.xlu1 %v2082_v6, %s1903_s13  ;;  %s1803_s24 = scalar_lea.vmem %s1377_s25, 128  ;;  %s1907_s13 = smov [#allocation11]  }
 0x123   : > { %p1804_p8 = scmp.ne.s32.totalorder %s1377_s25, %s1803_s24  ;;  %s1807_s18 = sshll.u32 %s1907_s13, 4  ;;  %s1808_s18 = int_to_ptr.vmem [resolvable:$false] %s1807_s18 }
 0x124   : > { %s1809_s5 = scalar_lea.vmem %s1808_s18, 256  ;;  %p1810_p2 = scmp.lt.s32.totalorder %s1377_s25, %s1808_s18 }
 0x125   : > { %p1805_p9 = pnand %p1804_p8, %p2028_p7  ;;  %p1811_p13 = scmp.lt.s32.totalorder %s1809_s5, %s1803_s24 }
 0x126   : > { %378 = vrot.lane.b32.xlu0 %v2082_v6, %s1904_s14 }
 0x127   : > { %p1806_p11 = pneg %p1805_p9  ;;  %p1812_p0 = por %p1811_p13, %p1810_p2 }
 0x129   : > { %p1813_p5 = pnand %p1812_p0, %p1806_p11 }
 0x188   : > { %v369_v9 = vpop.permute.xlu1 %368  ;;  %v360_v10 = vpop.permute.xlu0 %359 }
 0x189   : > { %372 = vst.msk [vmem:[#allocation3 + $0x10] sm:$0xff] %vm340_vm2, %v369_v9  ;;  %362 = vst.msk [vmem:[#allocation3] sm:$0xff] %vm340_vm2, %v360_v10  ;;  %v1276_v10 = vld [vmem:[#allocation10 + $0x18] sm:$0xff] }
 0x18c   : > { %v364_v11 = vpop.permute.xlu0 %363  ;;  %v344_v12 = vpop.permute.xlu1 %343 }
 0x18d   : > { %367 = vst.msk [vmem:[#allocation3 + $0x8] sm:$0xff] %vm340_vm2, %v364_v11  ;;  %347 = vst.msk [vmem:[#allocation2 + $0x8] sm:$0xff] %vm340_vm2, %v344_v12 }
 0x190   : > { %v374_v13 = vpop.permute.xlu0 %373  ;;  %v349_v14 = vpop.permute.xlu1 %348  ;;  %v401_v15 = vld [vmem:[#allocation3] sm:$0xff]  ;;  %v403_v16 = vld [vmem:[#allocation3 + $0x10] sm:$0xff] }
 0x191   : > { %377 = vst.msk [vmem:[#allocation3 + $0x18] sm:$0xff] %vm340_vm2, %v374_v13  ;;  %352 = vst.msk [vmem:[#allocation2 + $0x10] sm:$0xff] %vm340_vm2, %v349_v14  ;;  %1550 = vmatpush3.xpose.msk.msra.mxu1 %vm340_vm2, %v401_v15  ;;  %1560 = vmatpush3.xpose.msk.msra.mxu0 %vm340_vm2, %v403_v16 }
 0x192   : > { %1554 = vmatprep.subr.mxu1 %v1894_v0  ;;  %1569 = vmatprep.subr.mxu0 %v1894_v0 }
 0x194   : > { %v354_v18 = vpop.permute.xlu0 %353  ;;  %v383_v19 = vpop.permute.xlu1 %382  ;;  %1552 = vmatmul.mubr.msk.f32.vlgmr.msra.gmra.mxu1 %vm340_vm2, %v397_v17  ;;  %v402_v20 = vld [vmem:[#allocation3 + $0x8] sm:$0xff]  ;;  %v1200_v17 = vld [vmem:[#allocation10 + $0x10] sm:$0xff] }
 0x195   : > { %357 = vst.msk [vmem:[#allocation2 + $0x18] sm:$0xff] %vm340_vm2, %v354_v18  ;;  %386 = vst.msk [vmem:[#allocation4 + $0x8] sm:$0xff] %vm340_vm2, %v383_v19  ;;  %1555 = vmatpush3.xpose.msk.msra.mxu1 %vm340_vm2, %v402_v20  ;;  %1556 = vmatprep.mubr.msk.f32.mxu1 %vm1895_vm0, %v1894_v0  ;;  %v398_v21 = vld [vmem:[#allocation2 + $0x8] sm:$0xff] }
 0x196   : > { %1564 = vmatprep.subr.mxu1 %v1894_v0 }
 0x198   : > { %v379_v22 = vpop.permute.xlu0 %378  ;;  %1557 = vmatmul.mubr.msk.f32.vlgmr.msra.gmra.mxu1 %vm340_vm2, %v398_v21  ;;  %v399_v23 = vld [vmem:[#allocation2 + $0x10] sm:$0xff]  ;;  %v404_v24 = vld [vmem:[#allocation3 + $0x18] sm:$0xff] }
 0x199   : > { %381 = vst.msk [vmem:[#allocation4] sm:$0xff] %vm340_vm2, %v379_v22  ;;  %1562 = vmatmul.mubr.msk.f32.vlgmr.msra.gmra.mxu0 %vm340_vm2, %v399_v23  ;;  %1565 = vmatpush3.xpose.msk.msra.mxu1 %vm340_vm2, %v404_v24 }
 0x19a   : > { %1566 = vmatprep.mubr.msk.f32.mxu1 %vm1895_vm0, %v1894_v0  ;;  %1574 = vmatprep.subr.mxu1 %v1894_v0 }
 0x19b   : > { %1571 = vmatprep.mubr.msk.f32.mxu0 %vm1895_vm0, %v1894_v0 }
 0x19c   : > { %v400_v25 = vld [vmem:[#allocation2 + $0x18] sm:$0xff]  ;;  %v406_v26 = vld [vmem:[#allocation4 + $0x8] sm:$0xff] }
 0x19d   : > { %1567 = vmatmul.mubr.msk.f32.vlgmr.msra.gmra.mxu1 %vm340_vm2, %v400_v25 }
 0x19e   : > { %1575 = vmatpush3.msra.mxu1 %v406_v26  ;;  %1576 = vmatprep.mubr.msk.f32.mxu1 %vm1895_vm0, %v1894_v0 }
 0x19f   : > { %1584 = vmatprep.subr.mxu1 %v1894_v0 }
 0x1a0   : > { %v405_v27 = vld [vmem:[#allocation4] sm:$0xff] }
 0x1a1   : > { %1570 = vmatpush3.msra.mxu0 %v405_v27 }
 0x1a2   : > { %1579 = vmatprep.subr.mxu0 %v1894_v0 }
 0x254   : > { %v482_v28 = vpop.f32.mrf.mxu1 }
 0x255   : > { %v714_v29 = vsel %vm340_vm2, %v482_v28, -inf }
 0x256   : > { %715 = vmax.xlane.f32.xlu1 %v714_v29  ;;  %v1553_v30 = vpop.f32.mrf.mxu1 }
 0x258   : > { %v558_v31 = vpop.f32.mrf.mxu1 }
 0x259   : > { %v634_v32 = vpop.f32.mrf.mxu0  ;;  %v717_v38 = vsel %vm340_vm2, %v558_v31, -inf }
 0x25a   : > { %v1558_v33 = vpop.f32.mrf.mxu1  ;;  %v720_v34 = vsel %vm340_vm2, %v634_v32, -inf }
 0x25b   : > { %721 = vmax.xlane.f32.xlu0 %v720_v34  ;;  %v1563_v35 = vpop.f32.mrf.mxu0 }
 0x25d   : > { %v710_v36 = vpop.f32.mrf.mxu1 }
 0x25e   : > { %v723_v37 = vsel %vm340_vm2, %v710_v36, -inf }
 0x25f   : > { %724 = vmax.xlane.f32.xlu1 %v723_v37  ;;  %v1568_v39 = vpop.f32.mrf.mxu1  ;;  %718 = vmax.xlane.f32.xlu0 %v717_v38 }
 0x270   : > { %387 = vrot.lane.b32.xlu1 %v2082_v6, %s1905_s22 }
 0x275   : > { %392 = vrot.lane.b32.xlu0 %v2082_v6, %s1906_s29 }
 0x2df   : > { %v716_v40 = vpop.xlane.xlu1 %715 }
 0x2e0   : > { %v726_v41 = vsub.f32 %v482_v28, %v716_v40 }
 0x2e2   : > { %v730_v42 = vmul.f32 1.442695, %v726_v41 }
 0x2e4   : > { %1707 = vpow2.f32 %v730_v42  ;;  %v722_v43 = vpop.xlane.xlu0 %721 }
 0x2e5   : > { %v728_v44 = vsub.f32 %v634_v32, %v722_v43 }
 0x2e7   : > { %v734_v45 = vmul.f32 1.442695, %v728_v44 }
 0x2e8   : > { %v725_v46 = vpop.xlane.xlu1 %724  ;;  %v719_v47 = vpop.xlane.xlu0 %718 }
 0x2e9   : > { %1709 = vpow2.f32 %v734_v45  ;;  %v729_v48 = vsub.f32 %v710_v36, %v725_v46  ;;  %v727_v49 = vsub.f32 %v558_v31, %v719_v47 }
 0x2eb   : > { %v732_v50 = vmul.f32 1.442695, %v727_v49  ;;  %v736_v51 = vmul.f32 1.442695, %v729_v48 }
 0x2ec   : > { %v388_v52 = vpop.permute.xlu1 %387  ;;  %v393_v53 = vpop.permute.xlu0 %392 }
 0x2ed   : > { %391 = vst.msk [vmem:[#allocation4 + $0x10] sm:$0xff] %vm340_vm2, %v388_v52  ;;  %396 = vst.msk [vmem:[#allocation4 + $0x18] sm:$0xff] %vm340_vm2, %v393_v53  ;;  %1711 = vpow2.f32 %v732_v50 }
 0x2ee   : > { %1713 = vpow2.f32 %v736_v51 }
 0x2f1   : > { %v1708_v54 = vpop.eup %1707 }
 0x2f2   : > { %1572 = vmatmul.mubr.msk.f32.vlgmr.msra.gmra.mxu0 %vm340_vm2, %v1708_v54  ;;  %v738_v55 = vsel %vm340_vm2, %v1708_v54, 0.0 }
 0x2f3   : > { %739 = vadd.xlane.f32.xlu0 %v738_v55  ;;  %1581 = vmatprep.mubr.msk.f32.mxu0 %vm1895_vm0, %v1894_v0 }
 0x2f4   : > { %v407_v56 = vld [vmem:[#allocation4 + $0x10] sm:$0xff]  ;;  %v408_v60 = vld [vmem:[#allocation4 + $0x18] sm:$0xff] }
 0x2f5   : > { %1580 = vmatpush3.msra.mxu0 %v407_v56 }
 0x2f6   : > { %v1710_v57 = vpop.eup %1709  ;;  %1589 = vmatprep.subr.mxu0 %v1894_v0 }
 0x2f7   : > { %1582 = vmatmul.mubr.msk.f32.vlgmr.msra.gmra.mxu0 %vm340_vm2, %v1710_v57  ;;  %v744_v58 = vsel %vm340_vm2, %v1710_v57, 0.0 }
 0x2f8   : > { %745 = vadd.xlane.f32.xlu0 %v744_v58  ;;  %1591 = vmatprep.mubr.msk.f32.mxu0 %vm1895_vm0, %v1894_v0 }
 0x2f9   : > { %1590 = vmatpush3.msra.mxu0 %v1052_v2 }
 0x2fa   : > { %v1712_v59 = vpop.eup %1711  ;;  %1599 = vmatprep.subr.mxu0 %v1894_v0 }
 0x2fb   : > { %1577 = vmatmul.mubr.msk.f32.vlgmr.msra.gmra.mxu1 %vm340_vm2, %v1712_v59  ;;  %v741_v61 = vsel %vm340_vm2, %v1712_v59, 0.0  ;;  %v1714_v62 = vpop.eup %1713 }
 0x2fc   : > { %1585 = vmatpush3.msra.mxu1 %v408_v60  ;;  %742 = vadd.xlane.f32.xlu1 %v741_v61  ;;  %v747_v63 = vsel %vm340_vm2, %v1714_v62, 0.0 }
 0x2fd   : > { %1586 = vmatprep.mubr.msk.f32.mxu1 %vm1895_vm0, %v1894_v0  ;;  %1594 = vmatprep.subr.mxu1 %v1894_v0 }
 0x2ff   : > { %1587 = vmatmul.mubr.msk.f32.vlgmr.msra.gmra.mxu1 %vm340_vm2, %v1714_v62 }
 0x300   : > { %748 = vadd.xlane.f32.xlu1 %v747_v63  ;;  %1596 = vmatprep.mubr.msk.f32.mxu1 %vm1895_vm0, %v1894_v0 }
 0x301   : > { %1595 = vmatpush3.msra.mxu1 %v1050_v1 }
 0x302   : > { %1604 = vmatprep.subr.mxu1 %v1894_v0 }
 0x37c   : > { %v740_v3 = vpop.xlane.xlu0 %739 }
 0x37d   : > { %1715 = vrcp.f32 %v740_v3 }
 0x381   : > { %v746_v5 = vpop.xlane.xlu0 %745 }
 0x385   : > { %v743_v4 = vpop.xlane.xlu1 %742 }
 0x386   : > { %1717 = vrcp.f32 %v743_v4 }
 0x387   : > { %1719 = vrcp.f32 %v746_v5 }
 0x389   : > { %v749_v6 = vpop.xlane.xlu1 %748 }
 0x38a   : > { %v1716_v7 = vpop.eup %1715  ;;  %1721 = vrcp.f32 %v749_v6 }
 0x393   : > { %v1718_v14 = vpop.eup %1717 }
 0x394   : > { %v1720_v19 = vpop.eup %1719 }
 0x397   : > { %v1722_v20 = vpop.eup %1721 }
 0x3b2   : > { %v819_v8 = vpop.f32.mrf.mxu0 }
 0x3b3   : > { %v1046_v9 = vmul.f32 %v1716_v7, %v819_v8 }
 0x3b4   : > { %v1573_v11 = vpop.f32.mrf.mxu0 }
 0x3b5   : > { %1597 = vmatmul.mubr.msk.f32.vlgmr.msra.gmra.mxu1 %vm340_vm2, %v1046_v9 }
 0x3b6   : > { %1605 = vmatpush3.msra.mxu1 %v1276_v10  ;;  %1606 = vmatprep.mubr.msk.f32.mxu1 %vm1895_vm0, %v1894_v0 }
 0x3b7   : > { %v965_v12 = vpop.f32.mrf.mxu0 }
 0x3b8   : > { %v1048_v22 = vmul.f32 %v1720_v19, %v965_v12 }
 0x3b9   : > { %v1583_v13 = vpop.f32.mrf.mxu0 }
 0x3bb   : > { %v892_v15 = vpop.f32.mrf.mxu1 }
 0x3bc   : > { %v1047_v16 = vmul.f32 %v1718_v14, %v892_v15 }
 0x3bd   : > { %v1578_v18 = vpop.f32.mrf.mxu1 }
 0x3be   : > { %1592 = vmatmul.mubr.msk.f32.vlgmr.msra.gmra.mxu0 %vm340_vm2, %v1047_v16 }
 0x3bf   : > { %1600 = vmatpush3.msra.mxu0 %v1200_v17  ;;  %v1038_v21 = vpop.f32.mrf.mxu1  ;;  %1601 = vmatprep.mubr.msk.f32.mxu0 %vm1895_vm0, %v1894_v0  ;;  %v1504_v0 = vld [vmem:[%s2208_s3] ss:$0 sm:$0xff] }
 0x3c0   : > { %v1049_v23 = vmul.f32 %v1722_v20, %v1038_v21 }
 0x3c1   : > { %v1588_v24 = vpop.f32.mrf.mxu1 }
 0x3c2   : > { %1602 = vmatmul.mubr.msk.f32.vlgmr.msra.gmra.mxu0 %vm340_vm2, %v1048_v22  ;;  %1607 = vmatmul.mubr.msk.f32.vlgmr.msra.gmra.mxu1 %vm340_vm2, %v1049_v23 }
 0x475   : > { %v1195_v25 = vpop.f32.mrf.mxu1 }
 0x477   : > { %v1598_v26 = vpop.f32.mrf.mxu1 }
 0x47e   : > { %v1122_v27 = vpop.f32.mrf.mxu0 }
 0x47f   : > { %v1196_v29 = vadd.f32 %v1195_v25, %v1122_v27 }
 0x480   : > { %v1593_v28 = vpop.f32.mrf.mxu0 }
 0x482   : > { %v1270_v30 = vpop.f32.mrf.mxu0  ;;  %v1346_v31 = vpop.f32.mrf.mxu1 }
 0x483   : > { %v1274_v32 = vadd.f32 %v1270_v30, %v1196_v29 }
 0x484   : > { %v1603_v33 = vpop.f32.mrf.mxu0  ;;  %v1608_v34 = vpop.f32.mrf.mxu1 }
 0x485   : > { %v1350_v35 = vadd.f32 %v1346_v31, %v1274_v32 }
 0x487   : > { %v1358_v36 = vadd.f32 %v1504_v0, %v1350_v35 }
 0x489   : > { %1360 = vst.msk [vmem:[%s255_s23] sm:$0xff] %vm265_vm1, %v1358_v36 }
 0x48a   : > { %1816 = shalt.err (!%p1813_p5)
}
 0x48b   : > { %s1817_s14 = scalar_lea.hbm %s1374_s11, 128  ;;  %s1821_s29 = scalar_lea.hbm %s2209_s4, 256 }
 0x48c   : > { %p1818_p10 = scmp.ne.s32.totalorder %s1374_s11, %s1817_s14  ;;  %p1822_p6 = scmp.lt.s32.totalorder %s1374_s11, %s2209_s4 }
 0x48d   : > { %p1823_p12 = scmp.lt.s32.totalorder %s1821_s29, %s1817_s14 }
 0x48e   : > { %p1819_p1 = pnand %p1818_p10, %p2028_p7 }
 0x48f   : > { %p1824_p3 = por %p1823_p12, %p1822_p6 }
 0x490   : > { %p1820_p4 = pneg %p1819_p1 }
 0x492   : > { %p1825_p8 = pnand %p1824_p3, %p1820_p4 }
 0x494   : > { %1828 = shalt.err (!%p1825_p8)
}
 0x495   : > { %1619 = dma.vmem_to_hbm [thread:$0]  (%p2028_p7), %s1377_s25, 128, %s1374_s11, %s1362_s12  }
 0x496 PF: > { %s1388_s9 = sand.u32 1, %s1867_s15   ;;  %p2223_p9 = scmp.ne.s32.totalorder %s2216_s26, 0 }
 0x497   : > { %p2224_p11 = scmp.ge.s32.totalorder %s1887_s20, 2  ;;  %s1389_s23 = scalar_lea.sflag [#allocation7], %s1388_s9 }
 0x499   : > { %p1633_p2 = pnand %p2224_p11, %p2223_p9 }
 0x49b   : > { %p1634_p13 = pneg %p1633_p2 }
 0x49d   : > { %1862 = dma.done.wait (%p1634_p13), %s1389_s23, 128  }
 0x49e   : > { %1864 = vsyncadd (%p1634_p13), %s1389_s23, 4294967168  ;;  %s21_s20 = sadd.s32 1, %s1887_s20   ;;  %s2225_s15 = smov %s1871_s16 }
 0x49f   : > { %p18_p0 = scmp.ge.s32.totalorder %s21_s20, 4   ;;  %s2226_s16 = smov %s1875_s17 }
 0x4a0   : > { %s2227_s17 = smov %s2037_s7  ;;  %s2228_s18 = smov %s1883_s19 }
 0x4a1   : > { %s2229_s19 = smov %s2231_s21  ;;  %20 = sbr.rel (!%p18_p0) target bundleno = 7 (0x7), region = 105 }
 0x4a6   :  { %1394 = vsyncpa [#allocation6], 1 }
 0x4a7   :  { %1396 = vsyncpa [#allocation6 + $0x1], 1 }
 0x4a8   :  { %1397 = vsyncpa [#allocation9], 1 }
 0x4a9   :  { %1398 = vsyncpa [#allocation7], 1 }
 0x4aa   :  { %1400 = vsyncpa [#allocation7 + $0x1], 1 }

// kernel: tpu_custom_call.1
= control target key start
LH: loop header
LB: loop body
LE: loop exit
PB: predicated region body
PF: predicated region fallthrough
CT: control target
= control target key end

     0   :  { %9 = vsyncpa [#allocation6], 0  ;;  %s2205_s0 = inlined_call_operand.hbm [shape: f32[2,8,32], index: 0, kind: input, shape index: {}]   ;;  %s2206_s1 = inlined_call_operand.hbm [shape: f32[32,96], index: 1, kind: input, shape index: {}]   ;;  %s2207_s2 = inlined_call_operand.hbm [shape: f32[4,8,32], index: 2, kind: input, shape index: {}]   ;;  %s2208_s3 = inlined_call_operand.vmem [shape: f32[1,32], index: 3, kind: input, shape index: {}]   ;;  %s2209_s4 = inlined_call_operand.hbm [shape: f32[2,8,32], index: 4, kind: output, shape index: {}]  }
   0x1   :  { %11 = vsyncpa [#allocation6 + $0x1], 0 }
   0x2   :  { %12 = vsyncpa [#allocation9], 0 }
   0x3   :  { %13 = vsyncpa [#allocation7], 0 }
   0x4   :  { %15 = vsyncpa [#allocation7 + $0x1], 0  ;;  %s1933_s15 = smov 0   ;;  %s1935_s16 = smov 0  }
   0x5   :  { %s1937_s17 = smov 0   ;;  %s1939_s18 = smov 0  }
   0x6   :  { %s1941_s19 = smov 0   ;;  %s1943_s20 = smov 0  }
   0x7 LB: > { %s1474_s21 = sadd.s32 4294967295, %s1887_s20   ;;  %s1475_s22 = sadd.s32 4294967294, %s1887_s20   ;;  %s1887_s20 = sphi %s1943_s20, %s21_s20   ;;  %s1883_s19 = sphi %s1941_s19, %s2229_s19   ;;  %s1879_s18 = sphi %s1939_s18, %s2228_s18   ;;  %s1875_s17 = sphi %s1937_s17, %s2227_s17   ;;  %s1871_s16 = sphi %s1935_s16, %s2226_s16   ;;  %s1867_s15 = sphi %s1933_s15, %s2225_s15  }
   0x8   : > { %p53_p0 = scmp.ne.s32.totalorder %s1871_s16, %s1867_s15  ;;  %p1967_p1 = scmp.eq.s32.totalorder %s1474_s21, 0 }
   0x9   : > { %p1971_p2 = scmp.eq.s32.totalorder %s1474_s21, 1  ;;  %p148_p3 = scmp.eq.s32.totalorder %s1475_s22, 1 }
   0xa   : > { %s2213_s23 = scalar_select %p1967_p1, 1, 0 }
   0xb   : > { %p1977_p4 = por %p1967_p1, %p53_p0  ;;  %p1476_p5 = scmp.ge.s32.totalorder %s1887_s20, 1 }
   0xc   : > { %p1982_p6 = por %p148_p3, %p53_p0  ;;  %p155_p7 = scmp.lt.s32.totalorder %s1887_s20, 3 }
   0xd   : > { %s2215_s25 = scalar_select %p1977_p4, 1, 0 }
   0xe   : > { %s2216_s26 = scalar_select %p1982_p6, 1, 0 }
   0xf   : > { %p1987_p8 = pnand %p1476_p5, %p155_p7  ;;  %s1889_s28 = smov [#allocation8]  }
  0x10   : > { %s167_s29 = sshll.u32 %s1889_s28, 4  ;;  %s1890_s5 = smov [#allocation10]   ;;  %s168_s29 = int_to_ptr.vmem [resolvable:$true] %s167_s29 }
  0x11   : > { %p1621_p9 = pneg %p1987_p8  ;;  %s180_s6 = sshll.u32 %s1890_s5, 4  ;;  %s181_s6 = int_to_ptr.vmem [resolvable:$true] %s180_s6 }
  0x12   : > { %s1734_s7 = scalar_lea.vmem %s168_s29, 512  ;;  %p1742_p5 = scmp.lt.s32.totalorder %s168_s29, %s168_s29 }
  0x13   : > { %p1996_p11 = pnand %p1621_p9, %p1967_p1  ;;  %p1735_p13 = scmp.ne.s32.totalorder %s168_s29, %s1734_s7 }
  0x14   : > { %p1743_p7 = scmp.lt.s32.totalorder %s1734_s7, %s1734_s7 }
  0x15   : > { %p1725_p12 = pneg %p1996_p11 }
  0x16   : > { %p1744_p10 = por %p1743_p7, %p1742_p5 }
  0x17   : > { %p1737_p0 = pnand %p1735_p13, %p1725_p12 }
  0x19   : > { %p1738_p3 = pneg %p1737_p0 }
  0x1b   : > { %p1745_p9 = pnand %p1744_p10, %p1738_p3 }
  0x1d   : > { %1748 = shalt.err (!%p1745_p9)
}
  0x1e   : > { %s1891_s8 = smov 128   ;;  %s1892_s9 = smov 8  }
  0x1f   : > { %1624 = dma.hbm_to_vmem [thread:$0]  (!%p1996_p11), %s2206_s1, 512, %s168_s29, [#allocation9], %s1891_s8, %s1891_s8, %s1892_s9  }
  0x20   : > { %s1760_s12 = scalar_lea.vmem %s181_s6, 512  ;;  %p1768_p1 = scmp.lt.s32.totalorder %s181_s6, %s181_s6 }
  0x21   : > { %p1761_p6 = scmp.ne.s32.totalorder %s181_s6, %s1760_s12  ;;  %p1769_p4 = scmp.lt.s32.totalorder %s1760_s12, %s1760_s12 }
  0x23   : > { %p1763_p13 = pnand %p1761_p6, %p1725_p12  ;;  %p1770_p5 = por %p1769_p4, %p1768_p1 }
  0x25   : > { %p1764_p0 = pneg %p1763_p13 }
  0x27   : > { %p1771_p10 = pnand %p1770_p5, %p1764_p0 }
  0x29   : > { %1774 = shalt.err (!%p1771_p10)
}
  0x2a   : > { %1627 = dma.hbm_to_vmem [thread:$0]  (!%p1996_p11), %s2207_s2, 512, %s181_s6, [#allocation9], %s1891_s8, %s1891_s8, %s1892_s9  }
  0x2b   : > { %s33_s21 = sadd.s32 1, %s1883_s19  ;;  %s40_s22 = sadd.s32 1, %s1875_s17 }
  0x2c   : > { %p35_p1 = scmp.ge.s32.totalorder %s33_s21, 2  ;;  %p47_p4 = scmp.ne.s32.totalorder %s1875_s17, %s1871_s16 }
  0x2d   : > { %p48_p6 = scmp.eq.s32.totalorder %s1887_s20, 0  ;;  %p1638_p12 = scmp.lt.s32.totalorder %s1887_s20, 2 }
  0x2e   : > { %s2231_s21 = smov (%p35_p1, %s33_s21), 0  ;;  %p2028_p7 = por %p1971_p2, %p47_p4 }
  0x2f   : > { %p49_p3 = por %p48_p6, %p47_p4  ;;  %s37_s29 = ssub.s32 %s1883_s19, %s2231_s21 }
  0x30   : > { %s197_s30 = sand.u32 1, %s1875_s17   ;;  %p38_p9 = scmp.eq.s32.totalorder %s37_s29, 0 }
  0x31   : > { %s1480_s5 = sshll.u32 %s197_s30, 3  ;;  %s1481_s6 = sshll.u32 %s1883_s19, 7 }
  0x32   : > { %s2037_s7 = scalar_select %p38_p9, %s1875_s17, %s40_s22  }
  0x33   : > { %s206_s10 = scalar_lea.hbm %s2205_s0, %s1481_s6  ;;  %s201_s11 = scalar_lea.vmem [#allocation5], %s1480_s5 }
  0x34   : > { %s208_s12 = sshll.u32 %s201_s11, 4  ;;  %p2044_p11 = pnand %p1638_p12, %p49_p3  ;;  %s209_s12 = int_to_ptr.vmem [resolvable:$true] %s208_s12 }
  0x35   : > { %s198_s13 = scalar_lea.sflag [#allocation6], %s197_s30  ;;  %s1788_s14 = scalar_lea.vmem %s209_s12, 128 }
  0x36   : > { %p1777_p2 = pneg %p2044_p11  ;;  %p1789_p13 = scmp.ne.s32.totalorder %s209_s12, %s1788_s14 }
  0x37   : > { %s1893_s22 = smov [#allocation5]  }
  0x38   : > { %p1791_p0 = pnand %p1789_p13, %p1777_p2  ;;  %s1793_s29 = sshll.u32 %s1893_s22, 4  ;;  %s1794_s29 = int_to_ptr.vmem [resolvable:$false] %s1793_s29 }
  0x39   : > { %s1795_s6 = scalar_lea.vmem %s1794_s29, 256  ;;  %p1796_p10 = scmp.lt.s32.totalorder %s209_s12, %s1794_s29 }
  0x3a   : > { %p1792_p5 = pneg %p1791_p0  ;;  %p1797_p1 = scmp.lt.s32.totalorder %s1795_s6, %s1788_s14 }
  0x3c   : > { %p1798_p4 = por %p1797_p1, %p1796_p10 }
  0x3e   : > { %p1799_p6 = pnand %p1798_p4, %p1792_p5 }
  0x40   : > { %1802 = shalt.err (!%p1799_p6)
}
  0x41   : > { %1631 = dma.hbm_to_vmem [thread:$0]  (!%p2044_p11), %s206_s10, 128, %s209_s12, %s198_s13  }
  0x42   : > { %217 = sbr.rel (%p1987_p8) target bundleno = 1174 (0x496), region = 36  ;;  %s2055_s30 = sand.u32 (!%p1987_p8), 1, %s1871_s16  }
  0x43   : > { %s1483_s5 = sshll.u32 (!%p1987_p8), %s2055_s30, 3  ;;  %s220_s8 = scalar_lea.sflag (!%p1987_p8), [#allocation6], %s2055_s30 }
  0x44   : > { %s223_s9 = scalar_lea.vmem (!%p1987_p8), [#allocation5], %s1483_s5  ;;  %p2221_p12 = scmp.ne.s32.totalorder (!%p1987_p8), %s2215_s25, 0 }
  0x47   : > { %1854 = dma.done.wait (%p2221_p12), %s220_s8, 128  }
  0x48   : > { %1856 = vsyncadd (%p2221_p12), %s220_s8, 4294967168  ;;  %p2222_p3 = scmp.ne.s32.totalorder %s2213_s23, 0 }
  0x4a   : > { %1858 = dma.done.wait (%p2222_p3), [#allocation9], 1024  }
  0x4b   : > { %1860 = vsyncadd (%p2222_p3), [#allocation9], 4294966272  ;;  %v1894_v0 = vmov 0.0   ;;  %vm1895_vm0 = vmmov 0   ;;  %v264_v1 = vld [vmem:[#allocation8 + $0x18] sm:$0xff]  ;;  %v263_v2 = vld [vmem:[#allocation8 + $0x10] sm:$0xff] }
  0x4c   : > { %1538 = vmatprep.subr.mxu0 %v1894_v0  ;;  %1546 = vmatprep.mubr.msk.f32.mxu0 %vm1895_vm0, %v1894_v0  ;;  %v262_v3 = vld [vmem:[#allocation8 + $0x8] sm:$0xff]  ;;  %v261_v4 = vld [vmem:[#allocation8] sm:$0xff]  ;;  %v260_v5 = vld [vmem:[%s223_s9] sm:$0xff]  ;;  %vm265_vm1 = vcmask 261120   ;;  %vm340_vm2 = vcmask 64512   ;;  %s1896_s23 = smov 80  }
  0x4d   : > { %1549 = vmatprep.subr.mxu1 %v1894_v0  ;;  %1551 = vmatprep.mubr.msk.f32.mxu1 %vm1895_vm0, %v1894_v0  ;;  %s1897_s25 = smov 96   ;;  %s1898_s27 = smov 88  }
  0x4e   : > { %1539 = vmatpush3.msra.mxu0 %v264_v1  ;;  %s1899_s10 = smov 120   ;;  %s1900_s11 = smov 72   ;;  %v1050_v1 = vld [vmem:[#allocation10] sm:$0xff] }
  0x4f   : > { %1540 = vmatprep.subr.mxu0 %v1894_v0  ;;  %s1901_s12 = smov 112   ;;  %s1902_s24 = smov 104  }
  0x50   : > { %1541 = vmatpush3.msra.mxu0 %v263_v2  ;;  %s1903_s13 = smov 56   ;;  %s1904_s14 = smov 64   ;;  %v1052_v2 = vld [vmem:[#allocation10 + $0x8] sm:$0xff] }
  0x51   : > { %1542 = vmatprep.subr.mxu0 %v1894_v0  ;;  %s1905_s22 = smov 48   ;;  %s1906_s29 = smov 40  }
  0x52   : > { %1543 = vmatpush3.msra.mxu0 %v262_v3  ;;  %s1506_s9 = sshll.u32 %s1879_s18, 7 }
  0x53   : > { %1544 = vmatprep.subr.mxu0 %v1894_v0 }
  0x54   : > { %1545 = vmatpush3.msra.mxu0 %v261_v4 }
  0x55   : > { %1547 = vmatmul.mubr.msk.f32.vlgmr.msra.gmra.mxu0 %vm265_vm1, %v260_v5  ;;  %1559 = vmatprep.subr.mxu0 %v1894_v0 }
  0x56   : > { %1561 = vmatprep.mubr.msk.f32.mxu0 %vm1895_vm0, %v1894_v0 }
 0x115   : > { %v2082_v6 = vpop.f32.mrf.mxu0 }
 0x116   : > { %368 = vrot.lane.b32.xlu1 %v2082_v6, %s1896_s23  ;;  %359 = vrot.lane.b32.xlu0 %v2082_v6, %s1897_s25  ;;  %v339_v7 = vmul.f32 0.35355338, %v2082_v6  ;;  %s255_s23 = scalar_lea.vmem [#allocation11], %s1483_s5 }
 0x117   : > { %v1548_v8 = vpop.f32.mrf.mxu0  ;;  %s1376_s25 = sshll.u32 %s255_s23, 4  ;;  %s1377_s25 = int_to_ptr.vmem [resolvable:$true] %s1376_s25 }
 0x118   : > { %341 = vst.msk [vmem:[#allocation2] sm:$0xff] %vm340_vm2, %v339_v7 }
 0x11a   : > { %363 = vrot.lane.b32.xlu0 %v2082_v6, %s1898_s27  ;;  %343 = vrot.lane.b32.xlu1 %v339_v7, %s1899_s10 }
 0x11e   : > { %373 = vrot.lane.b32.xlu0 %v2082_v6, %s1900_s11  ;;  %348 = vrot.lane.b32.xlu1 %v339_v7, %s1901_s12  ;;  %s1374_s11 = scalar_lea.hbm %s2209_s4, %s1506_s9  ;;  %s1362_s12 = scalar_lea.sflag [#allocation7], %s2055_s30 }
 0x11f   : > { %v397_v17 = vld [vmem:[#allocation2] sm:$0xff] }
 0x122   : > { %353 = vrot.lane.b32.xlu0 %v339_v7, %s1902_s24  ;;  %382 = vrot.lane.b32.xlu1 %v2082_v6, %s1903_s13  ;;  %s1803_s24 = scalar_lea.vmem %s1377_s25, 128  ;;  %s1907_s13 = smov [#allocation11]  }
 0x123   : > { %p1804_p8 = scmp.ne.s32.totalorder %s1377_s25, %s1803_s24  ;;  %s1807_s18 = sshll.u32 %s1907_s13, 4  ;;  %s1808_s18 = int_to_ptr.vmem [resolvable:$false] %s1807_s18 }
 0x124   : > { %s1809_s5 = scalar_lea.vmem %s1808_s18, 256  ;;  %p1810_p2 = scmp.lt.s32.totalorder %s1377_s25, %s1808_s18 }
 0x125   : > { %p1805_p9 = pnand %p1804_p8, %p2028_p7  ;;  %p1811_p13 = scmp.lt.s32.totalorder %s1809_s5, %s1803_s24 }
 0x126   : > { %378 = vrot.lane.b32.xlu0 %v2082_v6, %s1904_s14 }
 0x127   : > { %p1806_p11 = pneg %p1805_p9  ;;  %p1812_p0 = por %p1811_p13, %p1810_p2 }
 0x129   : > { %p1813_p5 = pnand %p1812_p0, %p1806_p11 }
 0x188   : > { %v369_v9 = vpop.permute.xlu1 %368  ;;  %v360_v10 = vpop.permute.xlu0 %359 }
 0x189   : > { %372 = vst.msk [vmem:[#allocation3 + $0x10] sm:$0xff] %vm340_vm2, %v369_v9  ;;  %362 = vst.msk [vmem:[#allocation3] sm:$0xff] %vm340_vm2, %v360_v10  ;;  %v1276_v10 = vld [vmem:[#allocation10 + $0x18] sm:$0xff] }
 0x18c   : > { %v364_v11 = vpop.permute.xlu0 %363  ;;  %v344_v12 = vpop.permute.xlu1 %343 }
 0x18d   : > { %367 = vst.msk [vmem:[#allocation3 + $0x8] sm:$0xff] %vm340_vm2, %v364_v11  ;;  %347 = vst.msk [vmem:[#allocation2 + $0x8] sm:$0xff] %vm340_vm2, %v344_v12 }
 0x190   : > { %v374_v13 = vpop.permute.xlu0 %373  ;;  %v349_v14 = vpop.permute.xlu1 %348  ;;  %v401_v15 = vld [vmem:[#allocation3] sm:$0xff]  ;;  %v403_v16 = vld [vmem:[#allocation3 + $0x10] sm:$0xff] }
 0x191   : > { %377 = vst.msk [vmem:[#allocation3 + $0x18] sm:$0xff] %vm340_vm2, %v374_v13  ;;  %352 = vst.msk [vmem:[#allocation2 + $0x10] sm:$0xff] %vm340_vm2, %v349_v14  ;;  %1550 = vmatpush3.xpose.msk.msra.mxu1 %vm340_vm2, %v401_v15  ;;  %1560 = vmatpush3.xpose.msk.msra.mxu0 %vm340_vm2, %v403_v16 }
 0x192   : > { %1554 = vmatprep.subr.mxu1 %v1894_v0  ;;  %1569 = vmatprep.subr.mxu0 %v1894_v0 }
 0x194   : > { %v354_v18 = vpop.permute.xlu0 %353  ;;  %v383_v19 = vpop.permute.xlu1 %382  ;;  %1552 = vmatmul.mubr.msk.f32.vlgmr.msra.gmra.mxu1 %vm340_vm2, %v397_v17  ;;  %v402_v20 = vld [vmem:[#allocation3 + $0x8] sm:$0xff]  ;;  %v1200_v17 = vld [vmem:[#allocation10 + $0x10] sm:$0xff] }
 0x195   : > { %357 = vst.msk [vmem:[#allocation2 + $0x18] sm:$0xff] %vm340_vm2, %v354_v18  ;;  %386 = vst.msk [vmem:[#allocation4 + $0x8] sm:$0xff] %vm340_vm2, %v383_v19  ;;  %1555 = vmatpush3.xpose.msk.msra.mxu1 %vm340_vm2, %v402_v20  ;;  %1556 = vmatprep.mubr.msk.f32.mxu1 %vm1895_vm0, %v1894_v0  ;;  %v398_v21 = vld [vmem:[#allocation2 + $0x8] sm:$0xff] }
 0x196   : > { %1564 = vmatprep.subr.mxu1 %v1894_v0 }
 0x198   : > { %v379_v22 = vpop.permute.xlu0 %378  ;;  %1557 = vmatmul.mubr.msk.f32.vlgmr.msra.gmra.mxu1 %vm340_vm2, %v398_v21  ;;  %v399_v23 = vld [vmem:[#allocation2 + $0x10] sm:$0xff]  ;;  %v404_v24 = vld [vmem:[#allocation3 + $0x18] sm:$0xff] }
 0x199   : > { %381 = vst.msk [vmem:[#allocation4] sm:$0xff] %vm340_vm2, %v379_v22  ;;  %1562 = vmatmul.mubr.msk.f32.vlgmr.msra.gmra.mxu0 %vm340_vm2, %v399_v23  ;;  %1565 = vmatpush3.xpose.msk.msra.mxu1 %vm340_vm2, %v404_v24 }
 0x19a   : > { %1566 = vmatprep.mubr.msk.f32.mxu1 %vm1895_vm0, %v1894_v0  ;;  %1574 = vmatprep.subr.mxu1 %v1894_v0 }
 0x19b   : > { %1571 = vmatprep.mubr.msk.f32.mxu0 %vm1895_vm0, %v1894_v0 }
 0x19c   : > { %v400_v25 = vld [vmem:[#allocation2 + $0x18] sm:$0xff]  ;;  %v406_v26 = vld [vmem:[#allocation4 + $0x8] sm:$0xff] }
 0x19d   : > { %1567 = vmatmul.mubr.msk.f32.vlgmr.msra.gmra.mxu1 %vm340_vm2, %v400_v25 }
 0x19e   : > { %1575 = vmatpush3.msra.mxu1 %v406_v26  ;;  %1576 = vmatprep.mubr.msk.f32.mxu1 %vm1895_vm0, %v1894_v0 }
 0x19f   : > { %1584 = vmatprep.subr.mxu1 %v1894_v0 }
 0x1a0   : > { %v405_v27 = vld [vmem:[#allocation4] sm:$0xff] }
 0x1a1   : > { %1570 = vmatpush3.msra.mxu0 %v405_v27 }
 0x1a2   : > { %1579 = vmatprep.subr.mxu0 %v1894_v0 }
 0x254   : > { %v482_v28 = vpop.f32.mrf.mxu1 }
 0x255   : > { %v714_v29 = vsel %vm340_vm2, %v482_v28, -inf }
 0x256   : > { %715 = vmax.xlane.f32.xlu1 %v714_v29  ;;  %v1553_v30 = vpop.f32.mrf.mxu1 }
 0x258   : > { %v558_v31 = vpop.f32.mrf.mxu1 }
 0x259   : > { %v634_v32 = vpop.f32.mrf.mxu0  ;;  %v717_v38 = vsel %vm340_vm2, %v558_v31, -inf }
 0x25a   : > { %v1558_v33 = vpop.f32.mrf.mxu1  ;;  %v720_v34 = vsel %vm340_vm2, %v634_v32, -inf }
 0x25b   : > { %721 = vmax.xlane.f32.xlu0 %v720_v34  ;;  %v1563_v35 = vpop.f32.mrf.mxu0 }
 0x25d   : > { %v710_v36 = vpop.f32.mrf.mxu1 }
 0x25e   : > { %v723_v37 = vsel %vm340_vm2, %v710_v36, -inf }
 0x25f   : > { %724 = vmax.xlane.f32.xlu1 %v723_v37  ;;  %v1568_v39 = vpop.f32.mrf.mxu1  ;;  %718 = vmax.xlane.f32.xlu0 %v717_v38 }
 0x270   : > { %387 = vrot.lane.b32.xlu1 %v2082_v6, %s1905_s22 }
 0x275   : > { %392 = vrot.lane.b32.xlu0 %v2082_v6, %s1906_s29 }
 0x2df   : > { %v716_v40 = vpop.xlane.xlu1 %715 }
 0x2e0   : > { %v726_v41 = vsub.f32 %v482_v28, %v716_v40 }
 0x2e2   : > { %v730_v42 = vmul.f32 1.442695, %v726_v41 }
 0x2e4   : > { %1707 = vpow2.f32 %v730_v42  ;;  %v722_v43 = vpop.xlane.xlu0 %721 }
 0x2e5   : > { %v728_v44 = vsub.f32 %v634_v32, %v722_v43 }
 0x2e7   : > { %v734_v45 = vmul.f32 1.442695, %v728_v44 }
 0x2e8   : > { %v725_v46 = vpop.xlane.xlu1 %724  ;;  %v719_v47 = vpop.xlane.xlu0 %718 }
 0x2e9   : > { %1709 = vpow2.f32 %v734_v45  ;;  %v729_v48 = vsub.f32 %v710_v36, %v725_v46  ;;  %v727_v49 = vsub.f32 %v558_v31, %v719_v47 }
 0x2eb   : > { %v732_v50 = vmul.f32 1.442695, %v727_v49  ;;  %v736_v51 = vmul.f32 1.442695, %v729_v48 }
 0x2ec   : > { %v388_v52 = vpop.permute.xlu1 %387  ;;  %v393_v53 = vpop.permute.xlu0 %392 }
 0x2ed   : > { %391 = vst.msk [vmem:[#allocation4 + $0x10] sm:$0xff] %vm340_vm2, %v388_v52  ;;  %396 = vst.msk [vmem:[#allocation4 + $0x18] sm:$0xff] %vm340_vm2, %v393_v53  ;;  %1711 = vpow2.f32 %v732_v50 }
 0x2ee   : > { %1713 = vpow2.f32 %v736_v51 }
 0x2f1   : > { %v1708_v54 = vpop.eup %1707 }
 0x2f2   : > { %1572 = vmatmul.mubr.msk.f32.vlgmr.msra.gmra.mxu0 %vm340_vm2, %v1708_v54  ;;  %v738_v55 = vsel %vm340_vm2, %v1708_v54, 0.0 }
 0x2f3   : > { %739 = vadd.xlane.f32.xlu0 %v738_v55  ;;  %1581 = vmatprep.mubr.msk.f32.mxu0 %vm1895_vm0, %v1894_v0 }
 0x2f4   : > { %v407_v56 = vld [vmem:[#allocation4 + $0x10] sm:$0xff]  ;;  %v408_v60 = vld [vmem:[#allocation4 + $0x18] sm:$0xff] }
 0x2f5   : > { %1580 = vmatpush3.msra.mxu0 %v407_v56 }
 0x2f6   : > { %v1710_v57 = vpop.eup %1709  ;;  %1589 = vmatprep.subr.mxu0 %v1894_v0 }
 0x2f7   : > { %1582 = vmatmul.mubr.msk.f32.vlgmr.msra.gmra.mxu0 %vm340_vm2, %v1710_v57  ;;  %v744_v58 = vsel %vm340_vm2, %v1710_v57, 0.0 }
 0x2f8   : > { %745 = vadd.xlane.f32.xlu0 %v744_v58  ;;  %1591 = vmatprep.mubr.msk.f32.mxu0 %vm1895_vm0, %v1894_v0 }
 0x2f9   : > { %1590 = vmatpush3.msra.mxu0 %v1052_v2 }
 0x2fa   : > { %v1712_v59 = vpop.eup %1711  ;;  %1599 = vmatprep.subr.mxu0 %v1894_v0 }
 0x2fb   : > { %1577 = vmatmul.mubr.msk.f32.vlgmr.msra.gmra.mxu1 %vm340_vm2, %v1712_v59  ;;  %v741_v61 = vsel %vm340_vm2, %v1712_v59, 0.0  ;;  %v1714_v62 = vpop.eup %1713 }
 0x2fc   : > { %1585 = vmatpush3.msra.mxu1 %v408_v60  ;;  %742 = vadd.xlane.f32.xlu1 %v741_v61  ;;  %v747_v63 = vsel %vm340_vm2, %v1714_v62, 0.0 }
 0x2fd   : > { %1586 = vmatprep.mubr.msk.f32.mxu1 %vm1895_vm0, %v1894_v0  ;;  %1594 = vmatprep.subr.mxu1 %v1894_v0 }
 0x2ff   : > { %1587 = vmatmul.mubr.msk.f32.vlgmr.msra.gmra.mxu1 %vm340_vm2, %v1714_v62 }
 0x300   : > { %748 = vadd.xlane.f32.xlu1 %v747_v63  ;;  %1596 = vmatprep.mubr.msk.f32.mxu1 %vm1895_vm0, %v1894_v0 }
 0x301   : > { %1595 = vmatpush3.msra.mxu1 %v1050_v1 }
 0x302   : > { %1604 = vmatprep.subr.mxu1 %v1894_v0 }
 0x37c   : > { %v740_v3 = vpop.xlane.xlu0 %739 }
 0x37d   : > { %1715 = vrcp.f32 %v740_v3 }
 0x381   : > { %v746_v5 = vpop.xlane.xlu0 %745 }
 0x385   : > { %v743_v4 = vpop.xlane.xlu1 %742 }
 0x386   : > { %1717 = vrcp.f32 %v743_v4 }
 0x387   : > { %1719 = vrcp.f32 %v746_v5 }
 0x389   : > { %v749_v6 = vpop.xlane.xlu1 %748 }
 0x38a   : > { %v1716_v7 = vpop.eup %1715  ;;  %1721 = vrcp.f32 %v749_v6 }
 0x393   : > { %v1718_v14 = vpop.eup %1717 }
 0x394   : > { %v1720_v19 = vpop.eup %1719 }
 0x397   : > { %v1722_v20 = vpop.eup %1721 }
 0x3b2   : > { %v819_v8 = vpop.f32.mrf.mxu0 }
 0x3b3   : > { %v1046_v9 = vmul.f32 %v1716_v7, %v819_v8 }
 0x3b4   : > { %v1573_v11 = vpop.f32.mrf.mxu0 }
 0x3b5   : > { %1597 = vmatmul.mubr.msk.f32.vlgmr.msra.gmra.mxu1 %vm340_vm2, %v1046_v9 }
 0x3b6   : > { %1605 = vmatpush3.msra.mxu1 %v1276_v10  ;;  %1606 = vmatprep.mubr.msk.f32.mxu1 %vm1895_vm0, %v1894_v0 }
 0x3b7   : > { %v965_v12 = vpop.f32.mrf.mxu0 }
 0x3b8   : > { %v1048_v22 = vmul.f32 %v1720_v19, %v965_v12 }
 0x3b9   : > { %v1583_v13 = vpop.f32.mrf.mxu0 }
 0x3bb   : > { %v892_v15 = vpop.f32.mrf.mxu1 }
 0x3bc   : > { %v1047_v16 = vmul.f32 %v1718_v14, %v892_v15 }
 0x3bd   : > { %v1578_v18 = vpop.f32.mrf.mxu1 }
 0x3be   : > { %1592 = vmatmul.mubr.msk.f32.vlgmr.msra.gmra.mxu0 %vm340_vm2, %v1047_v16 }
 0x3bf   : > { %1600 = vmatpush3.msra.mxu0 %v1200_v17  ;;  %v1038_v21 = vpop.f32.mrf.mxu1  ;;  %1601 = vmatprep.mubr.msk.f32.mxu0 %vm1895_vm0, %v1894_v0  ;;  %v1504_v0 = vld [vmem:[%s2208_s3] ss:$0 sm:$0xff] }
 0x3c0   : > { %v1049_v23 = vmul.f32 %v1722_v20, %v1038_v21 }
 0x3c1   : > { %v1588_v24 = vpop.f32.mrf.mxu1 }
 0x3c2   : > { %1602 = vmatmul.mubr.msk.f32.vlgmr.msra.gmra.mxu0 %vm340_vm2, %v1048_v22  ;;  %1607 = vmatmul.mubr.msk.f32.vlgmr.msra.gmra.mxu1 %vm340_vm2, %v1049_v23 }
 0x475   : > { %v1195_v25 = vpop.f32.mrf.mxu1 }
 0x477   : > { %v1598_v26 = vpop.f32.mrf.mxu1 }
 0x47e   : > { %v1122_v27 = vpop.f32.mrf.mxu0 }
 0x47f   : > { %v1196_v29 = vadd.f32 %v1195_v25, %v1122_v27 }
 0x480   : > { %v1593_v28 = vpop.f32.mrf.mxu0 }
 0x482   : > { %v1270_v30 = vpop.f32.mrf.mxu0  ;;  %v1346_v31 = vpop.f32.mrf.mxu1 }
 0x483   : > { %v1274_v32 = vadd.f32 %v1270_v30, %v1196_v29 }
 0x484   : > { %v1603_v33 = vpop.f32.mrf.mxu0  ;;  %v1608_v34 = vpop.f32.mrf.mxu1 }
 0x485   : > { %v1350_v35 = vadd.f32 %v1346_v31, %v1274_v32 }
 0x487   : > { %v1358_v36 = vadd.f32 %v1504_v0, %v1350_v35 }
 0x489   : > { %1360 = vst.msk [vmem:[%s255_s23] sm:$0xff] %vm265_vm1, %v1358_v36 }
 0x48a   : > { %1816 = shalt.err (!%p1813_p5)
}
 0x48b   : > { %s1817_s14 = scalar_lea.hbm %s1374_s11, 128  ;;  %s1821_s29 = scalar_lea.hbm %s2209_s4, 256 }
 0x48c   : > { %p1818_p10 = scmp.ne.s32.totalorder %s1374_s11, %s1817_s14  ;;  %p1822_p6 = scmp.lt.s32.totalorder %s1374_s11, %s2209_s4 }
 0x48d   : > { %p1823_p12 = scmp.lt.s32.totalorder %s1821_s29, %s1817_s14 }
 0x48e   : > { %p1819_p1 = pnand %p1818_p10, %p2028_p7 }
 0x48f   : > { %p1824_p3 = por %p1823_p12, %p1822_p6 }
 0x490   : > { %p1820_p4 = pneg %p1819_p1 }
 0x492   : > { %p1825_p8 = pnand %p1824_p3, %p1820_p4 }
 0x494   : > { %1828 = shalt.err (!%p1825_p8)
}
 0x495   : > { %1619 = dma.vmem_to_hbm [thread:$0]  (%p2028_p7), %s1377_s25, 128, %s1374_s11, %s1362_s12  }
 0x496 PF: > { %s1388_s9 = sand.u32 1, %s1867_s15   ;;  %p2223_p9 = scmp.ne.s32.totalorder %s2216_s26, 0 }
 0x497   : > { %p2224_p11 = scmp.ge.s32.totalorder %s1887_s20, 2  ;;  %s1389_s23 = scalar_lea.sflag [#allocation7], %s1388_s9 }
 0x499   : > { %p1633_p2 = pnand %p2224_p11, %p2223_p9 }
 0x49b   : > { %p1634_p13 = pneg %p1633_p2 }
 0x49d   : > { %1862 = dma.done.wait (%p1634_p13), %s1389_s23, 128  }
 0x49e   : > { %1864 = vsyncadd (%p1634_p13), %s1389_s23, 4294967168  ;;  %s21_s20 = sadd.s32 1, %s1887_s20   ;;  %s2225_s15 = smov %s1871_s16 }
 0x49f   : > { %p18_p0 = scmp.ge.s32.totalorder %s21_s20, 4   ;;  %s2226_s16 = smov %s1875_s17 }
 0x4a0   : > { %s2227_s17 = smov %s2037_s7  ;;  %s2228_s18 = smov %s1883_s19 }
 0x4a1   : > { %s2229_s19 = smov %s2231_s21  ;;  %20 = sbr.rel (!%p18_p0) target bundleno = 7 (0x7), region = 105 }
 0x4a6   :  { %1394 = vsyncpa [#allocation6], 1 }
 0x4a7   :  { %1396 = vsyncpa [#allocation6 + $0x1], 1 }
 0x4a8   :  { %1397 = vsyncpa [#allocation9], 1 }
 0x4a9   :  { %1398 = vsyncpa [#allocation7], 1 }
 0x4aa   :  { %1400 = vsyncpa [#allocation7 + $0x1], 1 }

</bundles_post_ra>
